<compile_context>
chip_gen: v5e
topology: v5e:2x2
jax: 0.10.0
libtpu: 0.0.40
codegen_flags: <defaults>
</compile_context>

<pallas_src>
import jax
import jax.numpy as jnp
from jax.experimental import pallas as pl
from jax.experimental.pallas import tpu as pltpu


def _round_up(x, m):
    return ((x + m - 1) // m) * m


def _cdiv(a, b):
    return -(-a // b)


def _pick_batch_tile(B):
    """Batch tile: multiple of 16 (bf16 sublane pack), big enough to amortize the
    ~0.35us/grid-step overhead, small enough to give >= 4 grid steps (2 per v7x
    TensorCore) on large batches so the x/out DMAs actually pipeline."""
    if B <= 16:
        return 16
    B16 = _round_up(B, 16)
    if B16 >= 4 * 1024:
        tile = min(2048, _round_up(_cdiv(B16, 4), 16))  # >= 4 steps, <= 2048 rows
    elif B16 >= 256:
        tile = _round_up(_cdiv(B16, 2), 16)              # >= 2 steps
    else:
        tile = B16                                       # single step
    return max(16, min(tile, 2048))


def _mlp_kernel(x_ref, w1_ref, b1_ref, w2_ref, b2_ref, w3_ref, b3_ref,
                w4_ref, b4_ref, o_ref):
    # bf16 MXU operands, f32 accumulation via preferred_element_type.
    # Bias add + ReLU stay f32 (v5e has no bf16 VPU).
    x = x_ref[...].astype(jnp.bfloat16)
    h = jnp.dot(x, w1_ref[...], preferred_element_type=jnp.float32) + b1_ref[...]
    h = jnp.maximum(h, 0.0)
    h = jnp.dot(h.astype(jnp.bfloat16), w2_ref[...],
                preferred_element_type=jnp.float32) + b2_ref[...]
    h = jnp.maximum(h, 0.0)
    h = jnp.dot(h.astype(jnp.bfloat16), w3_ref[...],
                preferred_element_type=jnp.float32) + b3_ref[...]
    h = jnp.maximum(h, 0.0)
    out = jnp.dot(h.astype(jnp.bfloat16), w4_ref[...],
                  preferred_element_type=jnp.float32) + b4_ref[...]
    o_ref[...] = out.astype(o_ref.dtype)


def prepare_params(params):
    """Pad only the hidden dims (never stored to HBM) to multiples of 128; keep
    d_in / d_out exact. Weights stored bf16, biases f32. Zero padding is exact
    (zero columns -> zero activations -> ReLU keeps zero -> contribute nothing)."""
    d_in, d_h = params["w1"].shape
    d_out = params["w4"].shape[1]
    dh_p = _round_up(d_h, 128)

    def pad_w(w, rows, cols):
        return jnp.pad(w, ((0, rows - w.shape[0]), (0, cols - w.shape[1]))
                       ).astype(jnp.bfloat16)

    def pad_b(b, cols):
        return jnp.pad(b, ((0, 0), (0, cols - b.shape[1]))).astype(jnp.float32)

    prepped = {
        "w1": pad_w(params["w1"], d_in, dh_p),  "b1": pad_b(params["b1"], dh_p),
        "w2": pad_w(params["w2"], dh_p, dh_p),  "b2": pad_b(params["b2"], dh_p),
        "w3": pad_w(params["w3"], dh_p, dh_p),  "b3": pad_b(params["b3"], dh_p),
        "w4": pad_w(params["w4"], dh_p, d_out), "b4": pad_b(params["b4"], d_out),
    }
    dims = dict(d_in=d_in, d_h=d_h, d_out=d_out, dh_p=dh_p)
    return prepped, dims


def _jnp_forward(x, prepped):
    # Pure-XLA fallback (same bf16/f32 math) for configs whose resident weights
    # cannot fit VMEM.
    def mm(a, w):
        return jnp.dot(a.astype(jnp.bfloat16), w, preferred_element_type=jnp.float32)
    h = jnp.maximum(mm(x, prepped["w1"]) + prepped["b1"], 0.0)
    h = jnp.maximum(mm(h, prepped["w2"]) + prepped["b2"], 0.0)
    h = jnp.maximum(mm(h, prepped["w3"]) + prepped["b3"], 0.0)
    return mm(h, prepped["w4"]) + prepped["b4"]


def _build_pallas_call(batch_tile, B_pad, d_in, dh_p, d_out, vmem_limit, cost,
                       single_buffer_weights):
    spec_kwargs = {}
    if single_buffer_weights:
        # Grid-invariant operands: a single resident copy is enough; double
        # buffering them only doubles weight VMEM.
        spec_kwargs["pipeline_mode"] = pl.Buffered(1)

    def rep(shape):
        return pl.BlockSpec(shape, lambda i: (0, 0), **spec_kwargs)

    grid_spec = pltpu.PrefetchScalarGridSpec(
        num_scalar_prefetch=0,
        grid=(B_pad // batch_tile,),
        in_specs=[
            pl.BlockSpec((batch_tile, d_in), lambda i: (i, 0)),
            rep((d_in, dh_p)), rep((1, dh_p)),
            rep((dh_p, dh_p)), rep((1, dh_p)),
            rep((dh_p, dh_p)), rep((1, dh_p)),
            rep((dh_p, d_out)), rep((1, d_out)),
        ],
        out_specs=pl.BlockSpec((batch_tile, d_out), lambda i: (i, 0)),
    )
    return pl.pallas_call(
        _mlp_kernel,
        out_shape=jax.ShapeDtypeStruct((B_pad, d_out), jnp.float32),
        grid_spec=grid_spec,
        compiler_params=pltpu.CompilerParams(
            dimension_semantics=("parallel",),
            vmem_limit_bytes=vmem_limit),
        cost_estimate=cost,
    )


def neural_layer_forward(x, prepped, dims, *, batch_tile=None):
    """x: (B, input_dim) float32. Returns (B, num_classes) float32."""
    B, d_in = x.shape
    assert d_in == dims["d_in"]
    dh_p, d_out = dims["dh_p"], dims["d_out"]

    if batch_tile is None:
        batch_tile = _pick_batch_tile(B)
    batch_tile = max(16, (batch_tile // 16) * 16)
    B_pad = _round_up(max(B, batch_tile), batch_tile)

    # Only the batch dim is padded; no feature-dim pad of x (no K inflation).
    x_p = x if B_pad == B else jnp.pad(x, ((0, B_pad - B), (0, 0)))

    # --- VMEM / cost bookkeeping (bytes) ---
    w_bytes = 2 * (d_in * dh_p + 2 * dh_p * dh_p + dh_p * d_out)   # bf16 weights
    b_bytes = 4 * (3 * dh_p + d_out)                                # f32 biases
    io_bytes = 2 * batch_tile * (d_in + d_out) * 4                  # dbl-buffered x/out
    act_bytes = 3 * batch_tile * dh_p * 4                           # live f32 activations

    # Whole-weight residency is assumed by this kernel; fall back to XLA when it
    # cannot fit VMEM (e.g. very large intermediate_dim on v7x's 64 MiB).
    # TODO(synk): add a tiled-hidden-dim kernel path (extra "arbitrary" grid axis
    # over K/N with an f32 VMEM accumulator) instead of the XLA fallback.
    if w_bytes + b_bytes + io_bytes + act_bytes > 52 * 1024 * 1024:
        out = _jnp_forward(x_p, prepped)
        return out if B_pad == B else out[:B]

    # Conservative need (counts weights double-buffered in case the single-buffer
    # request is rejected). Raise the scoped limit early (v5e default is 16 MiB).
    need = io_bytes + 2 * (w_bytes + b_bytes) + act_bytes
    vmem_limit = None
    if need > 12 * 1024 * 1024:
        vmem_limit = min(int(need * 1.5), 48 * 1024 * 1024)

    flops = 2 * B_pad * (d_in * dh_p + 2 * dh_p * dh_p + dh_p * d_out)
    bytes_accessed = int(B_pad * (d_in + d_out) * 4 + w_bytes + b_bytes)
    cost = pl.CostEstimate(flops=flops, transcendentals=0,
                           bytes_accessed=bytes_accessed)

    call_args = (x_p, prepped["w1"], prepped["b1"], prepped["w2"], prepped["b2"],
                 prepped["w3"], prepped["b3"], prepped["w4"], prepped["b4"])
    try:
        out = _build_pallas_call(batch_tile, B_pad, d_in, dh_p, d_out,
                                 vmem_limit, cost, True)(*call_args)
    except Exception:
        # pl.Buffered(1) (single-buffered weights) not supported by this JAX
        # build -> retry with default double buffering.
        out = _build_pallas_call(batch_tile, B_pad, d_in, dh_p, d_out,
                                 vmem_limit, cost, False)(*call_args)

    return out if B_pad == B else out[:B]


def init_params(key, input_dim, intermediate_dim, num_classes):
    """PyTorch nn.Linear-style init: U(-1/sqrt(fan_in), 1/sqrt(fan_in)); W stored (in, out)."""
    shapes = [(input_dim, intermediate_dim),
              (intermediate_dim, intermediate_dim),
              (intermediate_dim, intermediate_dim),
              (intermediate_dim, num_classes)]
    params = {}
    for idx, (fan_in, fan_out) in enumerate(shapes, start=1):
        key, kw, kb = jax.random.split(key, 3)
        bound = 1.0 / jnp.sqrt(jnp.float32(fan_in))
        params[f"w{idx}"] = jax.random.uniform(
            kw, (fan_in, fan_out), jnp.float32, -bound, bound)
        params[f"b{idx}"] = jax.random.uniform(
            kb, (1, fan_out), jnp.float32, -bound, bound)
    return params


def _reference_forward_bf16(x, p):
    # Same math contract as the kernel: bf16 matmul operands, f32 accumulation.
    def mm(a, w):
        return jnp.dot(a.astype(jnp.bfloat16), w.astype(jnp.bfloat16),
                       preferred_element_type=jnp.float32)
    h = jnp.maximum(mm(x, p["w1"]) + p["b1"], 0.0)
    h = jnp.maximum(mm(h, p["w2"]) + p["b2"], 0.0)
    h = jnp.maximum(mm(h, p["w3"]) + p["b3"], 0.0)
    return mm(h, p["w4"]) + p["b4"]


def _reference_forward_f32(x, p):
    # Pure f32 reference (the original PyTorch semantics).
    h = jnp.maximum(x @ p["w1"] + p["b1"], 0.0)
    h = jnp.maximum(h @ p["w2"] + p["b2"], 0.0)
    h = jnp.maximum(h @ p["w3"] + p["b3"], 0.0)
    return h @ p["w4"] + p["b4"]


if __name__ == "__main__":
    input_dimension = 32
    intermediate_dimension = 64
    num_classes = 8
    batch = 256  # -> batch_tile=128, grid=(2,)

    key = jax.random.PRNGKey(0)
    key, kx = jax.random.split(key)
    x = jax.random.normal(kx, (batch, input_dimension), jnp.float32)
    params = init_params(key, input_dimension, intermediate_dimension, num_classes)

    prepped, dims = prepare_params(params)
    out = neural_layer_forward(x, prepped, dims)
    out = jax.block_until_ready(out)

    assert out.shape == (batch, num_classes)
    ref_bf16 = _reference_forward_bf16(x, params)
    ref_f32 = _reference_forward_f32(x, params)
    # Tight check vs the kernel's exact math contract (bf16 MXU, f32 accumulate).
    assert jnp.allclose(out, ref_bf16, atol=2e-3, rtol=2e-3), "mismatch vs bf16 reference"
    # Loose sanity check vs the pure-f32 PyTorch-equivalent forward.
    assert jnp.allclose(out, ref_f32, atol=1e-1, rtol=1e-1), "mismatch vs f32 reference"

    print("KERNEL_OK")
</pallas_src>

<mosaic_0001>
module attributes {stable_mosaic.version = 11 : i64} {
  func.func @_mlp_kernel(%arg0: i32, %arg1: memref<128x32xf32, #tpu.memory_space<vmem>>, %arg2: memref<32x128xbf16, #tpu.memory_space<vmem>>, %arg3: memref<1x128xf32, #tpu.memory_space<vmem>>, %arg4: memref<128x128xbf16, #tpu.memory_space<vmem>>, %arg5: memref<1x128xf32, #tpu.memory_space<vmem>>, %arg6: memref<128x128xbf16, #tpu.memory_space<vmem>>, %arg7: memref<1x128xf32, #tpu.memory_space<vmem>>, %arg8: memref<128x8xbf16, #tpu.memory_space<vmem>>, %arg9: memref<1x8xf32, #tpu.memory_space<vmem>>, %arg10: memref<128x8xf32, #tpu.memory_space<vmem>>) attributes {dimension_semantics = [#tpu.dimension_semantics<parallel>], iteration_bounds = array<i64: 2>, scalar_prefetch = 0 : i64, scratch_operands = 0 : i64, tpu.core_type = #tpu.core_type<tc>, window_params = [{transform_indices = @transform_0, window_bounds = array<i64: 128, 32>}, {pipeline_mode = #tpu.pipeline_mode<synchronous>, transform_indices = @transform_1, window_bounds = array<i64: 32, 128>}, {pipeline_mode = #tpu.pipeline_mode<synchronous>, transform_indices = @transform_2, window_bounds = array<i64: 1, 128>}, {pipeline_mode = #tpu.pipeline_mode<synchronous>, transform_indices = @transform_3, window_bounds = array<i64: 128, 128>}, {pipeline_mode = #tpu.pipeline_mode<synchronous>, transform_indices = @transform_4, window_bounds = array<i64: 1, 128>}, {pipeline_mode = #tpu.pipeline_mode<synchronous>, transform_indices = @transform_5, window_bounds = array<i64: 128, 128>}, {pipeline_mode = #tpu.pipeline_mode<synchronous>, transform_indices = @transform_6, window_bounds = array<i64: 1, 128>}, {pipeline_mode = #tpu.pipeline_mode<synchronous>, transform_indices = @transform_7, window_bounds = array<i64: 128, 8>}, {pipeline_mode = #tpu.pipeline_mode<synchronous>, transform_indices = @transform_8, window_bounds = array<i64: 1, 8>}, {transform_indices = @transform_9, window_bounds = array<i64: 128, 8>}]} {
    %c0 = arith.constant 0 : index
    %c0_0 = arith.constant 0 : index
    %0 = vector.load %arg1[%c0, %c0_0] : memref<128x32xf32, #tpu.memory_space<vmem>>, vector<128x32xf32>
    %1 = arith.truncf %0 : vector<128x32xf32> to vector<128x32xbf16>
    %c0_1 = arith.constant 0 : index
    %c0_2 = arith.constant 0 : index
    %2 = vector.load %arg2[%c0_1, %c0_2] : memref<32x128xbf16, #tpu.memory_space<vmem>>, vector<32x128xbf16>
    %cst = arith.constant dense<0.000000e+00> : vector<128x128xf32>
    %3 = tpu.matmul %1, %2, %cst {dimension_numbers = #tpu.dot_dimension_numbers<[1], [0], [0], [1], [0, 0, 1, 1], [], []>} : vector<128x32xbf16>, vector<32x128xbf16>, vector<128x128xf32> -> vector<128x128xf32>
    %c0_3 = arith.constant 0 : index
    %c0_4 = arith.constant 0 : index
    %4 = vector.load %arg3[%c0_3, %c0_4] : memref<1x128xf32, #tpu.memory_space<vmem>>, vector<1x128xf32>
    %5 = vector.broadcast %4 : vector<1x128xf32> to vector<128x128xf32>
    %6 = arith.addf %3, %5 : vector<128x128xf32>
    %cst_5 = arith.constant 0.000000e+00 : f32
    %7 = vector.broadcast %cst_5 : f32 to vector<128x128xf32>
    %8 = arith.maximumf %6, %7 : vector<128x128xf32>
    %9 = arith.truncf %8 : vector<128x128xf32> to vector<128x128xbf16>
    %c0_6 = arith.constant 0 : index
    %c0_7 = arith.constant 0 : index
    %10 = vector.load %arg4[%c0_6, %c0_7] : memref<128x128xbf16, #tpu.memory_space<vmem>>, vector<128x128xbf16>
    %cst_8 = arith.constant dense<0.000000e+00> : vector<128x128xf32>
    %11 = tpu.matmul %9, %10, %cst_8 {dimension_numbers = #tpu.dot_dimension_numbers<[1], [0], [0], [1], [0, 0, 1, 1], [], []>} : vector<128x128xbf16>, vector<128x128xbf16>, vector<128x128xf32> -> vector<128x128xf32>
    %c0_9 = arith.constant 0 : index
    %c0_10 = arith.constant 0 : index
    %12 = vector.load %arg5[%c0_9, %c0_10] : memref<1x128xf32, #tpu.memory_space<vmem>>, vector<1x128xf32>
    %13 = vector.broadcast %12 : vector<1x128xf32> to vector<128x128xf32>
    %14 = arith.addf %11, %13 : vector<128x128xf32>
    %cst_11 = arith.constant 0.000000e+00 : f32
    %15 = vector.broadcast %cst_11 : f32 to vector<128x128xf32>
    %16 = arith.maximumf %14, %15 : vector<128x128xf32>
    %17 = arith.truncf %16 : vector<128x128xf32> to vector<128x128xbf16>
    %c0_12 = arith.constant 0 : index
    %c0_13 = arith.constant 0 : index
    %18 = vector.load %arg6[%c0_12, %c0_13] : memref<128x128xbf16, #tpu.memory_space<vmem>>, vector<128x128xbf16>
    %cst_14 = arith.constant dense<0.000000e+00> : vector<128x128xf32>
    %19 = tpu.matmul %17, %18, %cst_14 {dimension_numbers = #tpu.dot_dimension_numbers<[1], [0], [0], [1], [0, 0, 1, 1], [], []>} : vector<128x128xbf16>, vector<128x128xbf16>, vector<128x128xf32> -> vector<128x128xf32>
    %c0_15 = arith.constant 0 : index
    %c0_16 = arith.constant 0 : index
    %20 = vector.load %arg7[%c0_15, %c0_16] : memref<1x128xf32, #tpu.memory_space<vmem>>, vector<1x128xf32>
    %21 = vector.broadcast %20 : vector<1x128xf32> to vector<128x128xf32>
    %22 = arith.addf %19, %21 : vector<128x128xf32>
    %cst_17 = arith.constant 0.000000e+00 : f32
    %23 = vector.broadcast %cst_17 : f32 to vector<128x128xf32>
    %24 = arith.maximumf %22, %23 : vector<128x128xf32>
    %25 = arith.truncf %24 : vector<128x128xf32> to vector<128x128xbf16>
    %c0_18 = arith.constant 0 : index
    %c0_19 = arith.constant 0 : index
    %26 = vector.load %arg8[%c0_18, %c0_19] : memref<128x8xbf16, #tpu.memory_space<vmem>>, vector<128x8xbf16>
    %cst_20 = arith.constant dense<0.000000e+00> : vector<128x8xf32>
    %27 = tpu.matmul %25, %26, %cst_20 {dimension_numbers = #tpu.dot_dimension_numbers<[1], [0], [0], [1], [0, 0, 1, 1], [], []>} : vector<128x128xbf16>, vector<128x8xbf16>, vector<128x8xf32> -> vector<128x8xf32>
    %c0_21 = arith.constant 0 : index
    %c0_22 = arith.constant 0 : index
    %28 = vector.load %arg9[%c0_21, %c0_22] : memref<1x8xf32, #tpu.memory_space<vmem>>, vector<1x8xf32>
    %29 = vector.broadcast %28 : vector<1x8xf32> to vector<128x8xf32>
    %30 = arith.addf %27, %29 : vector<128x8xf32>
    %c0_23 = arith.constant 0 : index
    %c0_24 = arith.constant 0 : index
    %31 = vector.load %arg10[%c0_23, %c0_24] : memref<128x8xf32, #tpu.memory_space<vmem>>, vector<128x8xf32>
    tpu.vector_store %arg10[%c0_23, %c0_24], %30 {strides = array<i32>} : memref<128x8xf32, #tpu.memory_space<vmem>>, vector<128x8xf32>,
    return
  }
  func.func @transform_0(%arg0: i32) -> (i32, i32) {
    %c0_i32 = arith.constant 0 : i32
    %c0_i32_0 = arith.constant 0 : i32
    return %arg0, %c0_i32 : i32, i32
  }
  func.func @transform_1(%arg0: i32) -> (i32, i32) {
    %c0_i32 = arith.constant 0 : i32
    %c0_i32_0 = arith.constant 0 : i32
    %c0_i32_1 = arith.constant 0 : i32
    return %c0_i32, %c0_i32_0 : i32, i32
  }
  func.func @transform_2(%arg0: i32) -> (i32, i32) {
    %c0_i32 = arith.constant 0 : i32
    %c0_i32_0 = arith.constant 0 : i32
    %c0_i32_1 = arith.constant 0 : i32
    return %c0_i32, %c0_i32_0 : i32, i32
  }
  func.func @transform_3(%arg0: i32) -> (i32, i32) {
    %c0_i32 = arith.constant 0 : i32
    %c0_i32_0 = arith.constant 0 : i32
    %c0_i32_1 = arith.constant 0 : i32
    return %c0_i32, %c0_i32_0 : i32, i32
  }
  func.func @transform_4(%arg0: i32) -> (i32, i32) {
    %c0_i32 = arith.constant 0 : i32
    %c0_i32_0 = arith.constant 0 : i32
    %c0_i32_1 = arith.constant 0 : i32
    return %c0_i32, %c0_i32_0 : i32, i32
  }
  func.func @transform_5(%arg0: i32) -> (i32, i32) {
    %c0_i32 = arith.constant 0 : i32
    %c0_i32_0 = arith.constant 0 : i32
    %c0_i32_1 = arith.constant 0 : i32
    return %c0_i32, %c0_i32_0 : i32, i32
  }
  func.func @transform_6(%arg0: i32) -> (i32, i32) {
    %c0_i32 = arith.constant 0 : i32
    %c0_i32_0 = arith.constant 0 : i32
    %c0_i32_1 = arith.constant 0 : i32
    return %c0_i32, %c0_i32_0 : i32, i32
  }
  func.func @transform_7(%arg0: i32) -> (i32, i32) {
    %c0_i32 = arith.constant 0 : i32
    %c0_i32_0 = arith.constant 0 : i32
    %c0_i32_1 = arith.constant 0 : i32
    return %c0_i32, %c0_i32_0 : i32, i32
  }
  func.func @transform_8(%arg0: i32) -> (i32, i32) {
    %c0_i32 = arith.constant 0 : i32
    %c0_i32_0 = arith.constant 0 : i32
    %c0_i32_1 = arith.constant 0 : i32
    return %c0_i32, %c0_i32_0 : i32, i32
  }
  func.func @transform_9(%arg0: i32) -> (i32, i32) {
    %c0_i32 = arith.constant 0 : i32
    %c0_i32_0 = arith.constant 0 : i32
    return %arg0, %c0_i32 : i32, i32
  }
}

module attributes {stable_mosaic.version = 11 : i64} {
  func.func @_mlp_kernel(%arg0: i32, %arg1: memref<128x32xf32, #tpu.memory_space<vmem>>, %arg2: memref<32x128xbf16, #tpu.memory_space<vmem>>, %arg3: memref<1x128xf32, #tpu.memory_space<vmem>>, %arg4: memref<128x128xbf16, #tpu.memory_space<vmem>>, %arg5: memref<1x128xf32, #tpu.memory_space<vmem>>, %arg6: memref<128x128xbf16, #tpu.memory_space<vmem>>, %arg7: memref<1x128xf32, #tpu.memory_space<vmem>>, %arg8: memref<128x8xbf16, #tpu.memory_space<vmem>>, %arg9: memref<1x8xf32, #tpu.memory_space<vmem>>, %arg10: memref<128x8xf32, #tpu.memory_space<vmem>>) attributes {dimension_semantics = [#tpu.dimension_semantics<parallel>], iteration_bounds = array<i64: 2>, scalar_prefetch = 0 : i64, scratch_operands = 0 : i64, tpu.core_type = #tpu.core_type<tc>, window_params = [{transform_indices = @transform_0, window_bounds = array<i64: 128, 32>}, {pipeline_mode = #tpu.pipeline_mode<synchronous>, transform_indices = @transform_1, window_bounds = array<i64: 32, 128>}, {pipeline_mode = #tpu.pipeline_mode<synchronous>, transform_indices = @transform_2, window_bounds = array<i64: 1, 128>}, {pipeline_mode = #tpu.pipeline_mode<synchronous>, transform_indices = @transform_3, window_bounds = array<i64: 128, 128>}, {pipeline_mode = #tpu.pipeline_mode<synchronous>, transform_indices = @transform_4, window_bounds = array<i64: 1, 128>}, {pipeline_mode = #tpu.pipeline_mode<synchronous>, transform_indices = @transform_5, window_bounds = array<i64: 128, 128>}, {pipeline_mode = #tpu.pipeline_mode<synchronous>, transform_indices = @transform_6, window_bounds = array<i64: 1, 128>}, {pipeline_mode = #tpu.pipeline_mode<synchronous>, transform_indices = @transform_7, window_bounds = array<i64: 128, 8>}, {pipeline_mode = #tpu.pipeline_mode<synchronous>, transform_indices = @transform_8, window_bounds = array<i64: 1, 8>}, {transform_indices = @transform_9, window_bounds = array<i64: 128, 8>}]} {
    %c0 = arith.constant 0 : index
    %c0_0 = arith.constant 0 : index
    %0 = vector.load %arg1[%c0, %c0_0] : memref<128x32xf32, #tpu.memory_space<vmem>>, vector<128x32xf32>
    %1 = arith.truncf %0 : vector<128x32xf32> to vector<128x32xbf16>
    %c0_1 = arith.constant 0 : index
    %c0_2 = arith.constant 0 : index
    %2 = vector.load %arg2[%c0_1, %c0_2] : memref<32x128xbf16, #tpu.memory_space<vmem>>, vector<32x128xbf16>
    %cst = arith.constant dense<0.000000e+00> : vector<128x128xf32>
    %3 = tpu.matmul %1, %2, %cst {dimension_numbers = #tpu.dot_dimension_numbers<[1], [0], [0], [1], [0, 0, 1, 1], [], []>} : vector<128x32xbf16>, vector<32x128xbf16>, vector<128x128xf32> -> vector<128x128xf32>
    %c0_3 = arith.constant 0 : index
    %c0_4 = arith.constant 0 : index
    %4 = vector.load %arg3[%c0_3, %c0_4] : memref<1x128xf32, #tpu.memory_space<vmem>>, vector<1x128xf32>
    %5 = vector.broadcast %4 : vector<1x128xf32> to vector<128x128xf32>
    %6 = arith.addf %3, %5 : vector<128x128xf32>
    %cst_5 = arith.constant 0.000000e+00 : f32
    %7 = vector.broadcast %cst_5 : f32 to vector<128x128xf32>
    %8 = arith.maximumf %6, %7 : vector<128x128xf32>
    %9 = arith.truncf %8 : vector<128x128xf32> to vector<128x128xbf16>
    %c0_6 = arith.constant 0 : index
    %c0_7 = arith.constant 0 : index
    %10 = vector.load %arg4[%c0_6, %c0_7] : memref<128x128xbf16, #tpu.memory_space<vmem>>, vector<128x128xbf16>
    %cst_8 = arith.constant dense<0.000000e+00> : vector<128x128xf32>
    %11 = tpu.matmul %9, %10, %cst_8 {dimension_numbers = #tpu.dot_dimension_numbers<[1], [0], [0], [1], [0, 0, 1, 1], [], []>} : vector<128x128xbf16>, vector<128x128xbf16>, vector<128x128xf32> -> vector<128x128xf32>
    %c0_9 = arith.constant 0 : index
    %c0_10 = arith.constant 0 : index
    %12 = vector.load %arg5[%c0_9, %c0_10] : memref<1x128xf32, #tpu.memory_space<vmem>>, vector<1x128xf32>
    %13 = vector.broadcast %12 : vector<1x128xf32> to vector<128x128xf32>
    %14 = arith.addf %11, %13 : vector<128x128xf32>
    %cst_11 = arith.constant 0.000000e+00 : f32
    %15 = vector.broadcast %cst_11 : f32 to vector<128x128xf32>
    %16 = arith.maximumf %14, %15 : vector<128x128xf32>
    %17 = arith.truncf %16 : vector<128x128xf32> to vector<128x128xbf16>
    %c0_12 = arith.constant 0 : index
    %c0_13 = arith.constant 0 : index
    %18 = vector.load %arg6[%c0_12, %c0_13] : memref<128x128xbf16, #tpu.memory_space<vmem>>, vector<128x128xbf16>
    %cst_14 = arith.constant dense<0.000000e+00> : vector<128x128xf32>
    %19 = tpu.matmul %17, %18, %cst_14 {dimension_numbers = #tpu.dot_dimension_numbers<[1], [0], [0], [1], [0, 0, 1, 1], [], []>} : vector<128x128xbf16>, vector<128x128xbf16>, vector<128x128xf32> -> vector<128x128xf32>
    %c0_15 = arith.constant 0 : index
    %c0_16 = arith.constant 0 : index
    %20 = vector.load %arg7[%c0_15, %c0_16] : memref<1x128xf32, #tpu.memory_space<vmem>>, vector<1x128xf32>
    %21 = vector.broadcast %20 : vector<1x128xf32> to vector<128x128xf32>
    %22 = arith.addf %19, %21 : vector<128x128xf32>
    %cst_17 = arith.constant 0.000000e+00 : f32
    %23 = vector.broadcast %cst_17 : f32 to vector<128x128xf32>
    %24 = arith.maximumf %22, %23 : vector<128x128xf32>
    %25 = arith.truncf %24 : vector<128x128xf32> to vector<128x128xbf16>
    %c0_18 = arith.constant 0 : index
    %c0_19 = arith.constant 0 : index
    %26 = vector.load %arg8[%c0_18, %c0_19] : memref<128x8xbf16, #tpu.memory_space<vmem>>, vector<128x8xbf16>
    %cst_20 = arith.constant dense<0.000000e+00> : vector<128x8xf32>
    %27 = tpu.matmul %25, %26, %cst_20 {dimension_numbers = #tpu.dot_dimension_numbers<[1], [0], [0], [1], [0, 0, 1, 1], [], []>} : vector<128x128xbf16>, vector<128x8xbf16>, vector<128x8xf32> -> vector<128x8xf32>
    %c0_21 = arith.constant 0 : index
    %c0_22 = arith.constant 0 : index
    %28 = vector.load %arg9[%c0_21, %c0_22] : memref<1x8xf32, #tpu.memory_space<vmem>>, vector<1x8xf32>
    %29 = vector.broadcast %28 : vector<1x8xf32> to vector<128x8xf32>
    %30 = arith.addf %27, %29 : vector<128x8xf32>
    %c0_23 = arith.constant 0 : index
    %c0_24 = arith.constant 0 : index
    %31 = vector.load %arg10[%c0_23, %c0_24] : memref<128x8xf32, #tpu.memory_space<vmem>>, vector<128x8xf32>
    tpu.vector_store %arg10[%c0_23, %c0_24], %30 {strides = array<i32>} : memref<128x8xf32, #tpu.memory_space<vmem>>, vector<128x8xf32>,
    return
  }
  func.func @transform_0(%arg0: i32) -> (i32, i32) {
    %c0_i32 = arith.constant 0 : i32
    %c0_i32_0 = arith.constant 0 : i32
    return %arg0, %c0_i32 : i32, i32
  }
  func.func @transform_1(%arg0: i32) -> (i32, i32) {
    %c0_i32 = arith.constant 0 : i32
    %c0_i32_0 = arith.constant 0 : i32
    %c0_i32_1 = arith.constant 0 : i32
    return %c0_i32, %c0_i32_0 : i32, i32
  }
  func.func @transform_2(%arg0: i32) -> (i32, i32) {
    %c0_i32 = arith.constant 0 : i32
    %c0_i32_0 = arith.constant 0 : i32
    %c0_i32_1 = arith.constant 0 : i32
    return %c0_i32, %c0_i32_0 : i32, i32
  }
  func.func @transform_3(%arg0: i32) -> (i32, i32) {
    %c0_i32 = arith.constant 0 : i32
    %c0_i32_0 = arith.constant 0 : i32
    %c0_i32_1 = arith.constant 0 : i32
    return %c0_i32, %c0_i32_0 : i32, i32
  }
  func.func @transform_4(%arg0: i32) -> (i32, i32) {
    %c0_i32 = arith.constant 0 : i32
    %c0_i32_0 = arith.constant 0 : i32
    %c0_i32_1 = arith.constant 0 : i32
    return %c0_i32, %c0_i32_0 : i32, i32
  }
  func.func @transform_5(%arg0: i32) -> (i32, i32) {
    %c0_i32 = arith.constant 0 : i32
    %c0_i32_0 = arith.constant 0 : i32
    %c0_i32_1 = arith.constant 0 : i32
    return %c0_i32, %c0_i32_0 : i32, i32
  }
  func.func @transform_6(%arg0: i32) -> (i32, i32) {
    %c0_i32 = arith.constant 0 : i32
    %c0_i32_0 = arith.constant 0 : i32
    %c0_i32_1 = arith.constant 0 : i32
    return %c0_i32, %c0_i32_0 : i32, i32
  }
  func.func @transform_7(%arg0: i32) -> (i32, i32) {
    %c0_i32 = arith.constant 0 : i32
    %c0_i32_0 = arith.constant 0 : i32
    %c0_i32_1 = arith.constant 0 : i32
    return %c0_i32, %c0_i32_0 : i32, i32
  }
  func.func @transform_8(%arg0: i32) -> (i32, i32) {
    %c0_i32 = arith.constant 0 : i32
    %c0_i32_0 = arith.constant 0 : i32
    %c0_i32_1 = arith.constant 0 : i32
    return %c0_i32, %c0_i32_0 : i32, i32
  }
  func.func @transform_9(%arg0: i32) -> (i32, i32) {
    %c0_i32 = arith.constant 0 : i32
    %c0_i32_0 = arith.constant 0 : i32
    return %arg0, %c0_i32 : i32, i32
  }
}

</mosaic_0001>

<bundles_post_ra>
// kernel: tpu_custom_call.1
= control target key start
LH: loop header
LB: loop body
LE: loop exit
PB: predicated region body
PF: predicated region fallthrough
CT: control target
= control target key end

     0   :  { %s1170_s30 = smov 0   ;;  %s1380_s0 = inlined_call_operand.vmem [shape: f32[256,32], index: 0, kind: input, shape index: {}]   ;;  %s1381_s1 = inlined_call_operand.vmem [shape: bf16[32,128], index: 1, kind: input, shape index: {}]   ;;  %s1382_s2 = inlined_call_operand.vmem [shape: f32[1,128], index: 2, kind: input, shape index: {}]   ;;  %s1383_s3 = inlined_call_operand.vmem [shape: bf16[128,128], index: 3, kind: input, shape index: {}]   ;;  %s1384_s4 = inlined_call_operand.vmem [shape: f32[1,128], index: 4, kind: input, shape index: {}]   ;;  %s1385_s5 = inlined_call_operand.vmem [shape: bf16[128,128], index: 5, kind: input, shape index: {}]   ;;  %s1386_s6 = inlined_call_operand.vmem [shape: f32[1,128], index: 6, kind: input, shape index: {}]   ;;  %s1387_s7 = inlined_call_operand.vmem [shape: bf16[128,8], index: 7, kind: input, shape index: {}]   ;;  %s1388_s8 = inlined_call_operand.vmem [shape: f32[1,8], index: 8, kind: input, shape index: {}]   ;;  %s1389_s9 = inlined_call_operand.vmem [shape: f32[256,8], index: 9, kind: output, shape index: {}]  }
   0x1 LB: > { %s951_s10 = sadd.s32 4294967295, %s1118_s30   ;;  %p955_p0 = scmp.ge.s32.totalorder %s1118_s30, 1  ;;  %s1118_s30 = sphi %s1170_s30, %s19_s30  }
   0x2   : > { %p288_p1 = scmp.lt.s32.totalorder %s1118_s30, 3 }
   0x4   : > { %p289_p2 = pnand %p955_p0, %p288_p1 }
   0x5   : > { %s956_s13 = sshll.u32 (!%p289_p2), %s951_s10, 4 }
   0x6   : > { %292 = sbr.rel (%p289_p2) target bundleno = 700 (0x2bc), region = 56  ;;  %p325_p3 = scmp.lt.s32.totalorder (!%p289_p2), %s956_s13, 31 }
   0xb   : > { %v1075_v0 = vld [vmem:[%s1381_s1 + $0x8] sm:$0xff]  ;;  %v1074_v1 = vld [vmem:[%s1381_s1] sm:$0xff]  ;;  %s1391_s13 = smov (!%p325_p3, %s956_s13), 31  ;;  %vm381_vm0 = vcmask 261120   ;;  %v1083_v17 = vld [vmem:[%s1383_s3 + $0x38] sm:$0xff]  ;;  %vm878_vm1 = vcmask 64512  }
   0xc   : > { %412 = vmatpush.bf16.msra.mxu0 %v1075_v0  ;;  %s957_s16 = sshll.u32 %s1391_s13, 3  ;;  %547 = vmatpush.bf16.msra.mxu1 %v1083_v17  ;;  %v1082_v21 = vld [vmem:[%s1383_s3 + $0x30] sm:$0xff]  ;;  %v1081_v22 = vld [vmem:[%s1383_s3 + $0x28] sm:$0xff]  ;;  %v1080_v23 = vld [vmem:[%s1383_s3 + $0x20] sm:$0xff] }
   0xd   : > { %s1192_s19 = scalar_lea.vmem %s1380_s0, %s957_s16  ;;  %v1079_v26 = vld [vmem:[%s1383_s3 + $0x18] sm:$0xff]  ;;  %v1078_v28 = vld [vmem:[%s1383_s3 + $0x10] sm:$0xff]  ;;  %v1077_v29 = vld [vmem:[%s1383_s3 + $0x8] sm:$0xff]  ;;  %s1343_s24 = scalar_lea.vmem %s1389_s9, %s957_s16 }
   0xe   : > { %v337_v2 = vld [vmem:[%s1192_s19] sm:$0xff]  ;;  %v338_v3 = vld [vmem:[%s1192_s19 + $0x8] sm:$0xff]  ;;  %v339_v5 = vld [vmem:[%s1192_s19 + $0x10] sm:$0xff] }
   0xf   : > { %v353_v4 = vpack.c.bf16 %v338_v3, %v337_v2  ;;  %v340_v6 = vld [vmem:[%s1192_s19 + $0x18] sm:$0xff]  ;;  %v341_v8 = vld [vmem:[%s1192_s19 + $0x20] sm:$0xff]  ;;  %v342_v9 = vld [vmem:[%s1192_s19 + $0x28] sm:$0xff] }
  0x10   : > { %413 = vmatpush.bf16.msra.mxu0 %v1074_v1  ;;  %v354_v7 = vpack.c.bf16 %v340_v6, %v339_v5  ;;  %v355_v10 = vpack.c.bf16 %v342_v9, %v341_v8  ;;  %v343_v11 = vld [vmem:[%s1192_s19 + $0x30] sm:$0xff]  ;;  %v344_v12 = vld [vmem:[%s1192_s19 + $0x38] sm:$0xff]  ;;  %v345_v14 = vld [vmem:[%s1192_s19 + $0x40] sm:$0xff]  ;;  %548 = vmatpush.bf16.msra.mxu1 %v1082_v21 }
  0x11   : > { %v356_v13 = vpack.c.bf16 %v344_v12, %v343_v11  ;;  %v346_v15 = vld [vmem:[%s1192_s19 + $0x48] sm:$0xff]  ;;  %v347_v18 = vld [vmem:[%s1192_s19 + $0x50] sm:$0xff]  ;;  %v348_v19 = vld [vmem:[%s1192_s19 + $0x58] sm:$0xff] }
  0x12   : > { %v357_v16 = vpack.c.bf16 %v346_v15, %v345_v14  ;;  %v358_v20 = vpack.c.bf16 %v348_v19, %v347_v18  ;;  %v349_v24 = vld [vmem:[%s1192_s19 + $0x60] sm:$0xff]  ;;  %v350_v25 = vld [vmem:[%s1192_s19 + $0x68] sm:$0xff]  ;;  %v351_v31 = vld [vmem:[%s1192_s19 + $0x70] sm:$0xff] }
  0x13   : > { %968 = vmatmul.msk.bf16.vlgmr.msra.gmra.mxu0 %vm381_vm0, %v353_v4  ;;  %v359_v27 = vpack.c.bf16 %v350_v25, %v349_v24  ;;  %v1076_v30 = vld [vmem:[%s1383_s3] sm:$0xff]  ;;  %v352_v32 = vld [vmem:[%s1192_s19 + $0x78] sm:$0xff]  ;;  %v1090_v14 = vld [vmem:[%s1385_s5 + $0x30] sm:$0xff] }
  0x14   : > { %549 = vmatpush.bf16.msra.mxu1 %v1081_v22  ;;  %v360_v33 = vpack.c.bf16 %v352_v32, %v351_v31  ;;  %v1245_v35 = vld [vmem:[%s1382_s2] ss:$0 sm:$0xff]  ;;  %v1087_v21 = vld [vmem:[%s1385_s5 + $0x18] sm:$0xff]  ;;  %v1086_v25 = vld [vmem:[%s1385_s5 + $0x10] sm:$0xff] }
  0x15   : > { %v1088_v17 = vld [vmem:[%s1385_s5 + $0x20] sm:$0xff] }
  0x18   : > { %550 = vmatpush.bf16.msra.mxu1 %v1080_v23 }
  0x1c   : > { %551 = vmatpush.bf16.msra.mxu1 %v1079_v26 }
  0x20   : > { %552 = vmatpush.bf16.msra.mxu1 %v1078_v28  ;;  %v1084_v28 = vld [vmem:[%s1385_s5] sm:$0xff] }
  0x23   : > { %969 = vmatmul.msk.bf16.gmra.mxu0 %vm381_vm0, %v354_v7 }
  0x24   : > { %553 = vmatpush.bf16.msra.mxu1 %v1077_v29 }
  0x28   : > { %554 = vmatpush.bf16.msra.mxu1 %v1076_v30 }
  0x33   : > { %970 = vmatmul.msk.bf16.gmra.mxu0 %vm381_vm0, %v355_v10  ;;  %v1091_v10 = vld [vmem:[%s1385_s5 + $0x38] sm:$0xff] }
  0x34   : > { %688 = vmatpush.bf16.msra.mxu2 %v1091_v10 }
  0x38   : > { %689 = vmatpush.bf16.msra.mxu2 %v1090_v14  ;;  %v1099_v14 = vld [vmem:[%s1387_s7 + $0x38] sm:$0xff] }
  0x39   : > { %829 = vmatpush.bf16.msra.mxu3 %v1099_v14 }
  0x43   : > { %971 = vmatmul.msk.bf16.gmra.mxu0 %vm381_vm0, %v356_v13 }
  0x53   : > { %972 = vmatmul.msk.bf16.gmra.mxu0 %vm381_vm0, %v357_v16  ;;  %v1089_v16 = vld [vmem:[%s1385_s5 + $0x28] sm:$0xff] }
  0x54   : > { %690 = vmatpush.bf16.msra.mxu2 %v1089_v16  ;;  %v1098_v16 = vld [vmem:[%s1387_s7 + $0x30] sm:$0xff] }
  0x55   : > { %830 = vmatpush.bf16.msra.mxu3 %v1098_v16 }
  0x58   : > { %691 = vmatpush.bf16.msra.mxu2 %v1088_v17  ;;  %v1097_v17 = vld [vmem:[%s1387_s7 + $0x28] sm:$0xff] }
  0x59   : > { %831 = vmatpush.bf16.msra.mxu3 %v1097_v17 }
  0x5c   : > { %692 = vmatpush.bf16.msra.mxu2 %v1087_v21  ;;  %v1096_v21 = vld [vmem:[%s1387_s7 + $0x20] sm:$0xff] }
  0x5d   : > { %832 = vmatpush.bf16.msra.mxu3 %v1096_v21 }
  0x60   : > { %693 = vmatpush.bf16.msra.mxu2 %v1086_v25 }
  0x63   : > { %973 = vmatmul.msk.bf16.gmra.mxu0 %vm381_vm0, %v358_v20 }
  0x73   : > { %974 = vmatmul.msk.bf16.gmra.mxu0 %vm381_vm0, %v359_v27  ;;  %v1085_v27 = vld [vmem:[%s1385_s5 + $0x8] sm:$0xff] }
  0x74   : > { %694 = vmatpush.bf16.msra.mxu2 %v1085_v27  ;;  %v1094_v27 = vld [vmem:[%s1387_s7 + $0x10] sm:$0xff] }
  0x78   : > { %695 = vmatpush.bf16.msra.mxu2 %v1084_v28 }
  0x83   : > { %975 = vmatmul.msk.bf16.gmra.mxu0 %vm381_vm0, %v360_v33 }
  0x90   : > { %v415_v34 = vpop.f32.mrf.mxu0 }
  0x91   : > { %v416_v36 = vadd.f32 %v1245_v35, %v415_v34 }
  0x93   : > { %v455_v39 = vmax.f32 %v416_v36, 0.0 }
  0x98   : > { %v417_v37 = vpop.f32.mrf.mxu0 }
  0x99   : > { %v418_v38 = vadd.f32 %v1245_v35, %v417_v37  ;;  %v1290_v37 = vld [vmem:[%s1384_s4] ss:$0 sm:$0xff] }
  0x9b   : > { %v456_v40 = vmax.f32 %v418_v38, 0.0 }
  0x9d   : > { %v471_v41 = vpack.c.bf16 %v456_v40, %v455_v39 }
  0x9f   : > { %555 = vmatmul.bf16.vlgmr.msra.gmra.mxu1 %v471_v41 }
  0xa0   : > { %v420_v42 = vpop.f32.mrf.mxu0 }
  0xa1   : > { %v421_v43 = vadd.f32 %v1245_v35, %v420_v42 }
  0xa3   : > { %v457_v46 = vmax.f32 %v421_v43, 0.0 }
  0xa8   : > { %v422_v44 = vpop.f32.mrf.mxu0 }
  0xa9   : > { %v423_v45 = vadd.f32 %v1245_v35, %v422_v44 }
  0xab   : > { %v458_v47 = vmax.f32 %v423_v45, 0.0 }
  0xad   : > { %v472_v48 = vpack.c.bf16 %v458_v47, %v457_v46 }
  0xaf   : > { %560 = vmatmul.bf16.gmra.mxu1 %v472_v48 }
  0xb0   : > { %v425_v49 = vpop.f32.mrf.mxu0 }
  0xb1   : > { %v426_v50 = vadd.f32 %v1245_v35, %v425_v49 }
  0xb3   : > { %v459_v53 = vmax.f32 %v426_v50, 0.0 }
  0xb8   : > { %v427_v51 = vpop.f32.mrf.mxu0 }
  0xb9   : > { %v428_v52 = vadd.f32 %v1245_v35, %v427_v51 }
  0xbb   : > { %v460_v54 = vmax.f32 %v428_v52, 0.0 }
  0xbd   : > { %v473_v55 = vpack.c.bf16 %v460_v54, %v459_v53 }
  0xbf   : > { %565 = vmatmul.bf16.gmra.mxu1 %v473_v55 }
  0xc0   : > { %v430_v56 = vpop.f32.mrf.mxu0 }
  0xc1   : > { %v431_v57 = vadd.f32 %v1245_v35, %v430_v56 }
  0xc3   : > { %v461_v60 = vmax.f32 %v431_v57, 0.0 }
  0xc8   : > { %v432_v58 = vpop.f32.mrf.mxu0 }
  0xc9   : > { %v433_v59 = vadd.f32 %v1245_v35, %v432_v58 }
  0xcb   : > { %v462_v61 = vmax.f32 %v433_v59, 0.0 }
  0xcd   : > { %v474_v62 = vpack.c.bf16 %v462_v61, %v461_v60 }
  0xcf   : > { %570 = vmatmul.bf16.gmra.mxu1 %v474_v62 }
  0xd0   : > { %v435_v63 = vpop.f32.mrf.mxu0 }
  0xd1   : > { %v436_v0 = vadd.f32 %v1245_v35, %v435_v63 }
  0xd3   : > { %v463_v3 = vmax.f32 %v436_v0, 0.0 }
  0xd8   : > { %v437_v1 = vpop.f32.mrf.mxu0 }
  0xd9   : > { %v438_v2 = vadd.f32 %v1245_v35, %v437_v1 }
  0xdb   : > { %v464_v4 = vmax.f32 %v438_v2, 0.0 }
  0xdd   : > { %v475_v5 = vpack.c.bf16 %v464_v4, %v463_v3 }
  0xdf   : > { %575 = vmatmul.bf16.gmra.mxu1 %v475_v5 }
  0xe0   : > { %v440_v6 = vpop.f32.mrf.mxu0 }
  0xe1   : > { %v441_v7 = vadd.f32 %v1245_v35, %v440_v6 }
  0xe3   : > { %v465_v11 = vmax.f32 %v441_v7, 0.0 }
  0xe8   : > { %v442_v8 = vpop.f32.mrf.mxu0 }
  0xe9   : > { %v443_v9 = vadd.f32 %v1245_v35, %v442_v8 }
  0xeb   : > { %v466_v12 = vmax.f32 %v443_v9, 0.0 }
  0xed   : > { %v476_v13 = vpack.c.bf16 %v466_v12, %v465_v11 }
  0xef   : > { %580 = vmatmul.bf16.gmra.mxu1 %v476_v13 }
  0xf0   : > { %v445_v15 = vpop.f32.mrf.mxu0 }
  0xf1   : > { %v446_v18 = vadd.f32 %v1245_v35, %v445_v15 }
  0xf3   : > { %v467_v22 = vmax.f32 %v446_v18, 0.0 }
  0xf8   : > { %v447_v19 = vpop.f32.mrf.mxu0 }
  0xf9   : > { %v448_v20 = vadd.f32 %v1245_v35, %v447_v19 }
  0xfb   : > { %v468_v23 = vmax.f32 %v448_v20, 0.0 }
  0xfd   : > { %v477_v24 = vpack.c.bf16 %v468_v23, %v467_v22 }
  0xff   : > { %585 = vmatmul.bf16.gmra.mxu1 %v477_v24 }
 0x100   : > { %v450_v26 = vpop.f32.mrf.mxu0 }
 0x101   : > { %v451_v29 = vadd.f32 %v1245_v35, %v450_v26  ;;  %v1095_v26 = vld [vmem:[%s1387_s7 + $0x18] sm:$0xff] }
 0x102   : > { %833 = vmatpush.bf16.msra.mxu3 %v1095_v26 }
 0x103   : > { %v469_v32 = vmax.f32 %v451_v29, 0.0 }
 0x106   : > { %834 = vmatpush.bf16.msra.mxu3 %v1094_v27 }
 0x108   : > { %v452_v30 = vpop.f32.mrf.mxu0 }
 0x109   : > { %v453_v31 = vadd.f32 %v1245_v35, %v452_v30  ;;  %v1093_v30 = vld [vmem:[%s1387_s7 + $0x8] sm:$0xff] }
 0x10a   : > { %835 = vmatpush.bf16.msra.mxu3 %v1093_v30 }
 0x10b   : > { %v470_v33 = vmax.f32 %v453_v31, 0.0 }
 0x10d   : > { %v478_v34 = vpack.c.bf16 %v470_v33, %v469_v32 }
 0x10f   : > { %590 = vmatmul.bf16.gmra.mxu1 %v478_v34  ;;  %v1092_v34 = vld [vmem:[%s1387_s7] sm:$0xff] }
 0x110   : > { %836 = vmatpush.bf16.msra.mxu3 %v1092_v34 }
 0x11c   : > { %v556_v36 = vpop.f32.mrf.mxu1 }
 0x11d   : > { %v557_v38 = vadd.f32 %v1290_v37, %v556_v36 }
 0x11f   : > { %v596_v41 = vmax.f32 %v557_v38, 0.0 }
 0x124   : > { %v558_v39 = vpop.f32.mrf.mxu1 }
 0x125   : > { %v559_v40 = vadd.f32 %v1290_v37, %v558_v39  ;;  %v1110_v39 = vld [vmem:[%s1386_s6] ss:$0 sm:$0xff] }
 0x127   : > { %v597_v42 = vmax.f32 %v559_v40, 0.0 }
 0x129   : > { %v612_v43 = vpack.c.bf16 %v597_v42, %v596_v41 }
 0x12b   : > { %696 = vmatmul.bf16.vlgmr.msra.gmra.mxu2 %v612_v43 }
 0x12c   : > { %v561_v35 = vpop.f32.mrf.mxu1 }
 0x12d   : > { %v562_v44 = vadd.f32 %v1290_v37, %v561_v35 }
 0x12f   : > { %v598_v47 = vmax.f32 %v562_v44, 0.0 }
 0x134   : > { %v563_v45 = vpop.f32.mrf.mxu1 }
 0x135   : > { %v564_v46 = vadd.f32 %v1290_v37, %v563_v45 }
 0x137   : > { %v599_v48 = vmax.f32 %v564_v46, 0.0 }
 0x139   : > { %v613_v49 = vpack.c.bf16 %v599_v48, %v598_v47 }
 0x13b   : > { %701 = vmatmul.bf16.gmra.mxu2 %v613_v49 }
 0x13c   : > { %v566_v50 = vpop.f32.mrf.mxu1 }
 0x13d   : > { %v567_v51 = vadd.f32 %v1290_v37, %v566_v50 }
 0x13f   : > { %v600_v54 = vmax.f32 %v567_v51, 0.0 }
 0x144   : > { %v568_v52 = vpop.f32.mrf.mxu1 }
 0x145   : > { %v569_v53 = vadd.f32 %v1290_v37, %v568_v52 }
 0x147   : > { %v601_v55 = vmax.f32 %v569_v53, 0.0 }
 0x149   : > { %v614_v56 = vpack.c.bf16 %v601_v55, %v600_v54 }
 0x14b   : > { %706 = vmatmul.bf16.gmra.mxu2 %v614_v56 }
 0x14c   : > { %v571_v57 = vpop.f32.mrf.mxu1 }
 0x14d   : > { %v572_v58 = vadd.f32 %v1290_v37, %v571_v57 }
 0x14f   : > { %v602_v61 = vmax.f32 %v572_v58, 0.0 }
 0x154   : > { %v573_v59 = vpop.f32.mrf.mxu1 }
 0x155   : > { %v574_v60 = vadd.f32 %v1290_v37, %v573_v59 }
 0x157   : > { %v603_v62 = vmax.f32 %v574_v60, 0.0 }
 0x159   : > { %v615_v63 = vpack.c.bf16 %v603_v62, %v602_v61 }
 0x15b   : > { %711 = vmatmul.bf16.gmra.mxu2 %v615_v63 }
 0x15c   : > { %v576_v0 = vpop.f32.mrf.mxu1 }
 0x15d   : > { %v577_v1 = vadd.f32 %v1290_v37, %v576_v0 }
 0x15f   : > { %v604_v4 = vmax.f32 %v577_v1, 0.0 }
 0x164   : > { %v578_v2 = vpop.f32.mrf.mxu1 }
 0x165   : > { %v579_v3 = vadd.f32 %v1290_v37, %v578_v2 }
 0x167   : > { %v605_v5 = vmax.f32 %v579_v3, 0.0 }
 0x169   : > { %v616_v6 = vpack.c.bf16 %v605_v5, %v604_v4 }
 0x16b   : > { %716 = vmatmul.bf16.gmra.mxu2 %v616_v6 }
 0x16c   : > { %v581_v7 = vpop.f32.mrf.mxu1 }
 0x16d   : > { %v582_v8 = vadd.f32 %v1290_v37, %v581_v7 }
 0x16f   : > { %v606_v11 = vmax.f32 %v582_v8, 0.0 }
 0x174   : > { %v583_v9 = vpop.f32.mrf.mxu1 }
 0x175   : > { %v584_v10 = vadd.f32 %v1290_v37, %v583_v9 }
 0x177   : > { %v607_v12 = vmax.f32 %v584_v10, 0.0 }
 0x179   : > { %v617_v13 = vpack.c.bf16 %v607_v12, %v606_v11 }
 0x17b   : > { %721 = vmatmul.bf16.gmra.mxu2 %v617_v13 }
 0x17c   : > { %v586_v15 = vpop.f32.mrf.mxu1 }
 0x17d   : > { %v587_v18 = vadd.f32 %v1290_v37, %v586_v15 }
 0x17f   : > { %v608_v22 = vmax.f32 %v587_v18, 0.0 }
 0x184   : > { %v588_v19 = vpop.f32.mrf.mxu1 }
 0x185   : > { %v589_v20 = vadd.f32 %v1290_v37, %v588_v19 }
 0x187   : > { %v609_v23 = vmax.f32 %v589_v20, 0.0 }
 0x189   : > { %v618_v24 = vpack.c.bf16 %v609_v23, %v608_v22 }
 0x18b   : > { %726 = vmatmul.bf16.gmra.mxu2 %v618_v24 }
 0x18c   : > { %v591_v25 = vpop.f32.mrf.mxu1 }
 0x18d   : > { %v592_v28 = vadd.f32 %v1290_v37, %v591_v25 }
 0x18f   : > { %v610_v32 = vmax.f32 %v592_v28, 0.0 }
 0x194   : > { %v593_v29 = vpop.f32.mrf.mxu1 }
 0x195   : > { %v594_v31 = vadd.f32 %v1290_v37, %v593_v29  ;;  %v1111_v29 = vld [vmem:[%s1388_s8] ss:$0 sm:$0xff] }
 0x197   : > { %v611_v33 = vmax.f32 %v594_v31, 0.0 }
 0x199   : > { %v619_v36 = vpack.c.bf16 %v611_v33, %v610_v32 }
 0x19b   : > { %731 = vmatmul.bf16.gmra.mxu2 %v619_v36 }
 0x1ae   : > { %v697_v38 = vpop.f32.mrf.mxu2 }
 0x1af   : > { %v698_v40 = vadd.f32 %v1110_v39, %v697_v38 }
 0x1b1   : > { %v737_v43 = vmax.f32 %v698_v40, 0.0 }
 0x1b6   : > { %v699_v41 = vpop.f32.mrf.mxu2 }
 0x1b7   : > { %v700_v42 = vadd.f32 %v1110_v39, %v699_v41 }
 0x1b9   : > { %v738_v37 = vmax.f32 %v700_v42, 0.0 }
 0x1bb   : > { %v753_v35 = vpack.c.bf16 %v738_v37, %v737_v43 }
 0x1bd   : > { %837 = vmatmul.bf16.vlgmr.msra.gmra.mxu3 %v753_v35 }
 0x1be   : > { %v702_v44 = vpop.f32.mrf.mxu2 }
 0x1bf   : > { %v703_v45 = vadd.f32 %v1110_v39, %v702_v44 }
 0x1c1   : > { %v739_v48 = vmax.f32 %v703_v45, 0.0 }
 0x1c6   : > { %v704_v46 = vpop.f32.mrf.mxu2 }
 0x1c7   : > { %v705_v47 = vadd.f32 %v1110_v39, %v704_v46 }
 0x1c9   : > { %v740_v49 = vmax.f32 %v705_v47, 0.0 }
 0x1cb   : > { %v754_v50 = vpack.c.bf16 %v740_v49, %v739_v48 }
 0x1cd   : > { %842 = vmatmul.bf16.gmra.mxu3 %v754_v50 }
 0x1ce   : > { %v707_v51 = vpop.f32.mrf.mxu2 }
 0x1cf   : > { %v708_v52 = vadd.f32 %v1110_v39, %v707_v51 }
 0x1d1   : > { %v741_v55 = vmax.f32 %v708_v52, 0.0 }
 0x1d6   : > { %v709_v53 = vpop.f32.mrf.mxu2 }
 0x1d7   : > { %v710_v54 = vadd.f32 %v1110_v39, %v709_v53 }
 0x1d9   : > { %v742_v56 = vmax.f32 %v710_v54, 0.0 }
 0x1db   : > { %v755_v57 = vpack.c.bf16 %v742_v56, %v741_v55 }
 0x1dd   : > { %847 = vmatmul.bf16.gmra.mxu3 %v755_v57 }
 0x1de   : > { %v712_v58 = vpop.f32.mrf.mxu2 }
 0x1df   : > { %v713_v59 = vadd.f32 %v1110_v39, %v712_v58 }
 0x1e1   : > { %v743_v62 = vmax.f32 %v713_v59, 0.0 }
 0x1e6   : > { %v714_v60 = vpop.f32.mrf.mxu2 }
 0x1e7   : > { %v715_v61 = vadd.f32 %v1110_v39, %v714_v60 }
 0x1e9   : > { %v744_v63 = vmax.f32 %v715_v61, 0.0 }
 0x1eb   : > { %v756_v0 = vpack.c.bf16 %v744_v63, %v743_v62 }
 0x1ed   : > { %852 = vmatmul.bf16.gmra.mxu3 %v756_v0 }
 0x1ee   : > { %v717_v1 = vpop.f32.mrf.mxu2 }
 0x1ef   : > { %v718_v2 = vadd.f32 %v1110_v39, %v717_v1 }
 0x1f1   : > { %v745_v5 = vmax.f32 %v718_v2, 0.0 }
 0x1f6   : > { %v719_v3 = vpop.f32.mrf.mxu2 }
 0x1f7   : > { %v720_v4 = vadd.f32 %v1110_v39, %v719_v3 }
 0x1f9   : > { %v746_v6 = vmax.f32 %v720_v4, 0.0 }
 0x1fb   : > { %v757_v7 = vpack.c.bf16 %v746_v6, %v745_v5 }
 0x1fd   : > { %857 = vmatmul.bf16.gmra.mxu3 %v757_v7 }
 0x1fe   : > { %v722_v8 = vpop.f32.mrf.mxu2 }
 0x1ff   : > { %v723_v9 = vadd.f32 %v1110_v39, %v722_v8 }
 0x201   : > { %v747_v12 = vmax.f32 %v723_v9, 0.0 }
 0x206   : > { %v724_v10 = vpop.f32.mrf.mxu2 }
 0x207   : > { %v725_v11 = vadd.f32 %v1110_v39, %v724_v10 }
 0x209   : > { %v748_v13 = vmax.f32 %v725_v11, 0.0 }
 0x20b   : > { %v758_v14 = vpack.c.bf16 %v748_v13, %v747_v12 }
 0x20d   : > { %862 = vmatmul.bf16.gmra.mxu3 %v758_v14 }
 0x20e   : > { %v727_v15 = vpop.f32.mrf.mxu2 }
 0x20f   : > { %v728_v16 = vadd.f32 %v1110_v39, %v727_v15 }
 0x211   : > { %v749_v19 = vmax.f32 %v728_v16, 0.0 }
 0x216   : > { %v729_v17 = vpop.f32.mrf.mxu2 }
 0x217   : > { %v730_v18 = vadd.f32 %v1110_v39, %v729_v17 }
 0x219   : > { %v750_v20 = vmax.f32 %v730_v18, 0.0 }
 0x21b   : > { %v759_v21 = vpack.c.bf16 %v750_v20, %v749_v19 }
 0x21d   : > { %867 = vmatmul.bf16.gmra.mxu3 %v759_v21 }
 0x21e   : > { %v732_v22 = vpop.f32.mrf.mxu2 }
 0x21f   : > { %v733_v23 = vadd.f32 %v1110_v39, %v732_v22 }
 0x221   : > { %v751_v26 = vmax.f32 %v733_v23, 0.0 }
 0x226   : > { %v734_v24 = vpop.f32.mrf.mxu2 }
 0x227   : > { %v735_v25 = vadd.f32 %v1110_v39, %v734_v24 }
 0x229   : > { %v752_v27 = vmax.f32 %v735_v25, 0.0 }
 0x22b   : > { %v760_v28 = vpack.c.bf16 %v752_v27, %v751_v26 }
 0x22d   : > { %872 = vmatmul.bf16.gmra.mxu3 %v760_v28 }
 0x240   : > { %v838_v30 = vpop.f32.mrf.mxu3 }
 0x241   : > { %v839_v31 = vadd.f32 %v1111_v29, %v838_v30 }
 0x243   : > { %879 = vst.msk [vmem:[%s1343_s24] sm:$0xff] %vm878_vm1, %v839_v31 }
 0x248   : > { %v840_v32 = vpop.f32.mrf.mxu3 }
 0x249   : > { %v841_v33 = vadd.f32 %v1111_v29, %v840_v32 }
 0x24b   : > { %880 = vst.msk [vmem:[%s1343_s24 + $0x8] sm:$0xff] %vm878_vm1, %v841_v33 }
 0x250   : > { %v843_v34 = vpop.f32.mrf.mxu3 }
 0x251   : > { %v844_v36 = vadd.f32 %v1111_v29, %v843_v34 }
 0x253   : > { %881 = vst.msk [vmem:[%s1343_s24 + $0x10] sm:$0xff] %vm878_vm1, %v844_v36 }
 0x258   : > { %v845_v38 = vpop.f32.mrf.mxu3 }
 0x259   : > { %v846_v39 = vadd.f32 %v1111_v29, %v845_v38 }
 0x25b   : > { %882 = vst.msk [vmem:[%s1343_s24 + $0x18] sm:$0xff] %vm878_vm1, %v846_v39 }
 0x260   : > { %v848_v40 = vpop.f32.mrf.mxu3 }
 0x261   : > { %v849_v41 = vadd.f32 %v1111_v29, %v848_v40 }
 0x263   : > { %883 = vst.msk [vmem:[%s1343_s24 + $0x20] sm:$0xff] %vm878_vm1, %v849_v41 }
 0x268   : > { %v850_v42 = vpop.f32.mrf.mxu3 }
 0x269   : > { %v851_v43 = vadd.f32 %v1111_v29, %v850_v42 }
 0x26b   : > { %884 = vst.msk [vmem:[%s1343_s24 + $0x28] sm:$0xff] %vm878_vm1, %v851_v43 }
 0x270   : > { %v853_v37 = vpop.f32.mrf.mxu3 }
 0x271   : > { %v854_v35 = vadd.f32 %v1111_v29, %v853_v37 }
 0x273   : > { %885 = vst.msk [vmem:[%s1343_s24 + $0x30] sm:$0xff] %vm878_vm1, %v854_v35 }
 0x278   : > { %v855_v44 = vpop.f32.mrf.mxu3 }
 0x279   : > { %v856_v45 = vadd.f32 %v1111_v29, %v855_v44 }
 0x27b   : > { %886 = vst.msk [vmem:[%s1343_s24 + $0x38] sm:$0xff] %vm878_vm1, %v856_v45 }
 0x280   : > { %v858_v46 = vpop.f32.mrf.mxu3 }
 0x281   : > { %v859_v47 = vadd.f32 %v1111_v29, %v858_v46 }
 0x283   : > { %887 = vst.msk [vmem:[%s1343_s24 + $0x40] sm:$0xff] %vm878_vm1, %v859_v47 }
 0x288   : > { %v860_v48 = vpop.f32.mrf.mxu3 }
 0x289   : > { %v861_v49 = vadd.f32 %v1111_v29, %v860_v48 }
 0x28b   : > { %888 = vst.msk [vmem:[%s1343_s24 + $0x48] sm:$0xff] %vm878_vm1, %v861_v49 }
 0x290   : > { %v863_v50 = vpop.f32.mrf.mxu3 }
 0x291   : > { %v864_v51 = vadd.f32 %v1111_v29, %v863_v50 }
 0x293   : > { %889 = vst.msk [vmem:[%s1343_s24 + $0x50] sm:$0xff] %vm878_vm1, %v864_v51 }
 0x298   : > { %v865_v52 = vpop.f32.mrf.mxu3 }
 0x299   : > { %v866_v53 = vadd.f32 %v1111_v29, %v865_v52 }
 0x29b   : > { %890 = vst.msk [vmem:[%s1343_s24 + $0x58] sm:$0xff] %vm878_vm1, %v866_v53 }
 0x2a0   : > { %v868_v54 = vpop.f32.mrf.mxu3 }
 0x2a1   : > { %v869_v55 = vadd.f32 %v1111_v29, %v868_v54 }
 0x2a3   : > { %891 = vst.msk [vmem:[%s1343_s24 + $0x60] sm:$0xff] %vm878_vm1, %v869_v55 }
 0x2a8   : > { %v870_v56 = vpop.f32.mrf.mxu3 }
 0x2a9   : > { %v871_v57 = vadd.f32 %v1111_v29, %v870_v56 }
 0x2ab   : > { %892 = vst.msk [vmem:[%s1343_s24 + $0x68] sm:$0xff] %vm878_vm1, %v871_v57 }
 0x2b0   : > { %v873_v58 = vpop.f32.mrf.mxu3 }
 0x2b1   : > { %v874_v59 = vadd.f32 %v1111_v29, %v873_v58 }
 0x2b3   : > { %893 = vst.msk [vmem:[%s1343_s24 + $0x70] sm:$0xff] %vm878_vm1, %v874_v59 }
 0x2b8   : > { %v875_v60 = vpop.f32.mrf.mxu3 }
 0x2b9   : > { %v876_v61 = vadd.f32 %v1111_v29, %v875_v60 }
 0x2bb   : > { %894 = vst.msk [vmem:[%s1343_s24 + $0x78] sm:$0xff] %vm878_vm1, %v876_v61 }
 0x2bc PF: > { %s19_s30 = sadd.s32 1, %s1118_s30  }
 0x2bd   : > { %p16_p4 = scmp.ge.s32.totalorder %s19_s30, 4  }
 0x2bf   :  { %18 = sbr.rel (!%p16_p4) target bundleno = 1 (0x1), region = 86 }

// kernel: tpu_custom_call.1
= control target key start
LH: loop header
LB: loop body
LE: loop exit
PB: predicated region body
PF: predicated region fallthrough
CT: control target
= control target key end

     0   :  { %s1170_s30 = smov 0   ;;  %s1380_s0 = inlined_call_operand.vmem [shape: f32[256,32], index: 0, kind: input, shape index: {}]   ;;  %s1381_s1 = inlined_call_operand.vmem [shape: bf16[32,128], index: 1, kind: input, shape index: {}]   ;;  %s1382_s2 = inlined_call_operand.vmem [shape: f32[1,128], index: 2, kind: input, shape index: {}]   ;;  %s1383_s3 = inlined_call_operand.vmem [shape: bf16[128,128], index: 3, kind: input, shape index: {}]   ;;  %s1384_s4 = inlined_call_operand.vmem [shape: f32[1,128], index: 4, kind: input, shape index: {}]   ;;  %s1385_s5 = inlined_call_operand.vmem [shape: bf16[128,128], index: 5, kind: input, shape index: {}]   ;;  %s1386_s6 = inlined_call_operand.vmem [shape: f32[1,128], index: 6, kind: input, shape index: {}]   ;;  %s1387_s7 = inlined_call_operand.vmem [shape: bf16[128,8], index: 7, kind: input, shape index: {}]   ;;  %s1388_s8 = inlined_call_operand.vmem [shape: f32[1,8], index: 8, kind: input, shape index: {}]   ;;  %s1389_s9 = inlined_call_operand.vmem [shape: f32[256,8], index: 9, kind: output, shape index: {}]  }
   0x1 LB: > { %s951_s10 = sadd.s32 4294967295, %s1118_s30   ;;  %p955_p0 = scmp.ge.s32.totalorder %s1118_s30, 1  ;;  %s1118_s30 = sphi %s1170_s30, %s19_s30  }
   0x2   : > { %p288_p1 = scmp.lt.s32.totalorder %s1118_s30, 3 }
   0x4   : > { %p289_p2 = pnand %p955_p0, %p288_p1 }
   0x5   : > { %s956_s13 = sshll.u32 (!%p289_p2), %s951_s10, 4 }
   0x6   : > { %292 = sbr.rel (%p289_p2) target bundleno = 700 (0x2bc), region = 56  ;;  %p325_p3 = scmp.lt.s32.totalorder (!%p289_p2), %s956_s13, 31 }
   0xb   : > { %v1075_v0 = vld [vmem:[%s1381_s1 + $0x8] sm:$0xff]  ;;  %v1074_v1 = vld [vmem:[%s1381_s1] sm:$0xff]  ;;  %s1391_s13 = smov (!%p325_p3, %s956_s13), 31  ;;  %vm381_vm0 = vcmask 261120   ;;  %v1083_v17 = vld [vmem:[%s1383_s3 + $0x38] sm:$0xff]  ;;  %vm878_vm1 = vcmask 64512  }
   0xc   : > { %412 = vmatpush.bf16.msra.mxu0 %v1075_v0  ;;  %s957_s16 = sshll.u32 %s1391_s13, 3  ;;  %547 = vmatpush.bf16.msra.mxu1 %v1083_v17  ;;  %v1082_v21 = vld [vmem:[%s1383_s3 + $0x30] sm:$0xff]  ;;  %v1081_v22 = vld [vmem:[%s1383_s3 + $0x28] sm:$0xff]  ;;  %v1080_v23 = vld [vmem:[%s1383_s3 + $0x20] sm:$0xff] }
   0xd   : > { %s1192_s19 = scalar_lea.vmem %s1380_s0, %s957_s16  ;;  %v1079_v26 = vld [vmem:[%s1383_s3 + $0x18] sm:$0xff]  ;;  %v1078_v28 = vld [vmem:[%s1383_s3 + $0x10] sm:$0xff]  ;;  %v1077_v29 = vld [vmem:[%s1383_s3 + $0x8] sm:$0xff]  ;;  %s1343_s24 = scalar_lea.vmem %s1389_s9, %s957_s16 }
   0xe   : > { %v337_v2 = vld [vmem:[%s1192_s19] sm:$0xff]  ;;  %v338_v3 = vld [vmem:[%s1192_s19 + $0x8] sm:$0xff]  ;;  %v339_v5 = vld [vmem:[%s1192_s19 + $0x10] sm:$0xff] }
   0xf   : > { %v353_v4 = vpack.c.bf16 %v338_v3, %v337_v2  ;;  %v340_v6 = vld [vmem:[%s1192_s19 + $0x18] sm:$0xff]  ;;  %v341_v8 = vld [vmem:[%s1192_s19 + $0x20] sm:$0xff]  ;;  %v342_v9 = vld [vmem:[%s1192_s19 + $0x28] sm:$0xff] }
  0x10   : > { %413 = vmatpush.bf16.msra.mxu0 %v1074_v1  ;;  %v354_v7 = vpack.c.bf16 %v340_v6, %v339_v5  ;;  %v355_v10 = vpack.c.bf16 %v342_v9, %v341_v8  ;;  %v343_v11 = vld [vmem:[%s1192_s19 + $0x30] sm:$0xff]  ;;  %v344_v12 = vld [vmem:[%s1192_s19 + $0x38] sm:$0xff]  ;;  %v345_v14 = vld [vmem:[%s1192_s19 + $0x40] sm:$0xff]  ;;  %548 = vmatpush.bf16.msra.mxu1 %v1082_v21 }
  0x11   : > { %v356_v13 = vpack.c.bf16 %v344_v12, %v343_v11  ;;  %v346_v15 = vld [vmem:[%s1192_s19 + $0x48] sm:$0xff]  ;;  %v347_v18 = vld [vmem:[%s1192_s19 + $0x50] sm:$0xff]  ;;  %v348_v19 = vld [vmem:[%s1192_s19 + $0x58] sm:$0xff] }
  0x12   : > { %v357_v16 = vpack.c.bf16 %v346_v15, %v345_v14  ;;  %v358_v20 = vpack.c.bf16 %v348_v19, %v347_v18  ;;  %v349_v24 = vld [vmem:[%s1192_s19 + $0x60] sm:$0xff]  ;;  %v350_v25 = vld [vmem:[%s1192_s19 + $0x68] sm:$0xff]  ;;  %v351_v31 = vld [vmem:[%s1192_s19 + $0x70] sm:$0xff] }
  0x13   : > { %968 = vmatmul.msk.bf16.vlgmr.msra.gmra.mxu0 %vm381_vm0, %v353_v4  ;;  %v359_v27 = vpack.c.bf16 %v350_v25, %v349_v24  ;;  %v1076_v30 = vld [vmem:[%s1383_s3] sm:$0xff]  ;;  %v352_v32 = vld [vmem:[%s1192_s19 + $0x78] sm:$0xff]  ;;  %v1090_v14 = vld [vmem:[%s1385_s5 + $0x30] sm:$0xff] }
  0x14   : > { %549 = vmatpush.bf16.msra.mxu1 %v1081_v22  ;;  %v360_v33 = vpack.c.bf16 %v352_v32, %v351_v31  ;;  %v1245_v35 = vld [vmem:[%s1382_s2] ss:$0 sm:$0xff]  ;;  %v1087_v21 = vld [vmem:[%s1385_s5 + $0x18] sm:$0xff]  ;;  %v1086_v25 = vld [vmem:[%s1385_s5 + $0x10] sm:$0xff] }
  0x15   : > { %v1088_v17 = vld [vmem:[%s1385_s5 + $0x20] sm:$0xff] }
  0x18   : > { %550 = vmatpush.bf16.msra.mxu1 %v1080_v23 }
  0x1c   : > { %551 = vmatpush.bf16.msra.mxu1 %v1079_v26 }
  0x20   : > { %552 = vmatpush.bf16.msra.mxu1 %v1078_v28  ;;  %v1084_v28 = vld [vmem:[%s1385_s5] sm:$0xff] }
  0x23   : > { %969 = vmatmul.msk.bf16.gmra.mxu0 %vm381_vm0, %v354_v7 }
  0x24   : > { %553 = vmatpush.bf16.msra.mxu1 %v1077_v29 }
  0x28   : > { %554 = vmatpush.bf16.msra.mxu1 %v1076_v30 }
  0x33   : > { %970 = vmatmul.msk.bf16.gmra.mxu0 %vm381_vm0, %v355_v10  ;;  %v1091_v10 = vld [vmem:[%s1385_s5 + $0x38] sm:$0xff] }
  0x34   : > { %688 = vmatpush.bf16.msra.mxu2 %v1091_v10 }
  0x38   : > { %689 = vmatpush.bf16.msra.mxu2 %v1090_v14  ;;  %v1099_v14 = vld [vmem:[%s1387_s7 + $0x38] sm:$0xff] }
  0x39   : > { %829 = vmatpush.bf16.msra.mxu3 %v1099_v14 }
  0x43   : > { %971 = vmatmul.msk.bf16.gmra.mxu0 %vm381_vm0, %v356_v13 }
  0x53   : > { %972 = vmatmul.msk.bf16.gmra.mxu0 %vm381_vm0, %v357_v16  ;;  %v1089_v16 = vld [vmem:[%s1385_s5 + $0x28] sm:$0xff] }
  0x54   : > { %690 = vmatpush.bf16.msra.mxu2 %v1089_v16  ;;  %v1098_v16 = vld [vmem:[%s1387_s7 + $0x30] sm:$0xff] }
  0x55   : > { %830 = vmatpush.bf16.msra.mxu3 %v1098_v16 }
  0x58   : > { %691 = vmatpush.bf16.msra.mxu2 %v1088_v17  ;;  %v1097_v17 = vld [vmem:[%s1387_s7 + $0x28] sm:$0xff] }
  0x59   : > { %831 = vmatpush.bf16.msra.mxu3 %v1097_v17 }
  0x5c   : > { %692 = vmatpush.bf16.msra.mxu2 %v1087_v21  ;;  %v1096_v21 = vld [vmem:[%s1387_s7 + $0x20] sm:$0xff] }
  0x5d   : > { %832 = vmatpush.bf16.msra.mxu3 %v1096_v21 }
  0x60   : > { %693 = vmatpush.bf16.msra.mxu2 %v1086_v25 }
  0x63   : > { %973 = vmatmul.msk.bf16.gmra.mxu0 %vm381_vm0, %v358_v20 }
  0x73   : > { %974 = vmatmul.msk.bf16.gmra.mxu0 %vm381_vm0, %v359_v27  ;;  %v1085_v27 = vld [vmem:[%s1385_s5 + $0x8] sm:$0xff] }
  0x74   : > { %694 = vmatpush.bf16.msra.mxu2 %v1085_v27  ;;  %v1094_v27 = vld [vmem:[%s1387_s7 + $0x10] sm:$0xff] }
  0x78   : > { %695 = vmatpush.bf16.msra.mxu2 %v1084_v28 }
  0x83   : > { %975 = vmatmul.msk.bf16.gmra.mxu0 %vm381_vm0, %v360_v33 }
  0x90   : > { %v415_v34 = vpop.f32.mrf.mxu0 }
  0x91   : > { %v416_v36 = vadd.f32 %v1245_v35, %v415_v34 }
  0x93   : > { %v455_v39 = vmax.f32 %v416_v36, 0.0 }
  0x98   : > { %v417_v37 = vpop.f32.mrf.mxu0 }
  0x99   : > { %v418_v38 = vadd.f32 %v1245_v35, %v417_v37  ;;  %v1290_v37 = vld [vmem:[%s1384_s4] ss:$0 sm:$0xff] }
  0x9b   : > { %v456_v40 = vmax.f32 %v418_v38, 0.0 }
  0x9d   : > { %v471_v41 = vpack.c.bf16 %v456_v40, %v455_v39 }
  0x9f   : > { %555 = vmatmul.bf16.vlgmr.msra.gmra.mxu1 %v471_v41 }
  0xa0   : > { %v420_v42 = vpop.f32.mrf.mxu0 }
  0xa1   : > { %v421_v43 = vadd.f32 %v1245_v35, %v420_v42 }
  0xa3   : > { %v457_v46 = vmax.f32 %v421_v43, 0.0 }
  0xa8   : > { %v422_v44 = vpop.f32.mrf.mxu0 }
  0xa9   : > { %v423_v45 = vadd.f32 %v1245_v35, %v422_v44 }
  0xab   : > { %v458_v47 = vmax.f32 %v423_v45, 0.0 }
  0xad   : > { %v472_v48 = vpack.c.bf16 %v458_v47, %v457_v46 }
  0xaf   : > { %560 = vmatmul.bf16.gmra.mxu1 %v472_v48 }
  0xb0   : > { %v425_v49 = vpop.f32.mrf.mxu0 }
  0xb1   : > { %v426_v50 = vadd.f32 %v1245_v35, %v425_v49 }
  0xb3   : > { %v459_v53 = vmax.f32 %v426_v50, 0.0 }
  0xb8   : > { %v427_v51 = vpop.f32.mrf.mxu0 }
  0xb9   : > { %v428_v52 = vadd.f32 %v1245_v35, %v427_v51 }
  0xbb   : > { %v460_v54 = vmax.f32 %v428_v52, 0.0 }
  0xbd   : > { %v473_v55 = vpack.c.bf16 %v460_v54, %v459_v53 }
  0xbf   : > { %565 = vmatmul.bf16.gmra.mxu1 %v473_v55 }
  0xc0   : > { %v430_v56 = vpop.f32.mrf.mxu0 }
  0xc1   : > { %v431_v57 = vadd.f32 %v1245_v35, %v430_v56 }
  0xc3   : > { %v461_v60 = vmax.f32 %v431_v57, 0.0 }
  0xc8   : > { %v432_v58 = vpop.f32.mrf.mxu0 }
  0xc9   : > { %v433_v59 = vadd.f32 %v1245_v35, %v432_v58 }
  0xcb   : > { %v462_v61 = vmax.f32 %v433_v59, 0.0 }
  0xcd   : > { %v474_v62 = vpack.c.bf16 %v462_v61, %v461_v60 }
  0xcf   : > { %570 = vmatmul.bf16.gmra.mxu1 %v474_v62 }
  0xd0   : > { %v435_v63 = vpop.f32.mrf.mxu0 }
  0xd1   : > { %v436_v0 = vadd.f32 %v1245_v35, %v435_v63 }
  0xd3   : > { %v463_v3 = vmax.f32 %v436_v0, 0.0 }
  0xd8   : > { %v437_v1 = vpop.f32.mrf.mxu0 }
  0xd9   : > { %v438_v2 = vadd.f32 %v1245_v35, %v437_v1 }
  0xdb   : > { %v464_v4 = vmax.f32 %v438_v2, 0.0 }
  0xdd   : > { %v475_v5 = vpack.c.bf16 %v464_v4, %v463_v3 }
  0xdf   : > { %575 = vmatmul.bf16.gmra.mxu1 %v475_v5 }
  0xe0   : > { %v440_v6 = vpop.f32.mrf.mxu0 }
  0xe1   : > { %v441_v7 = vadd.f32 %v1245_v35, %v440_v6 }
  0xe3   : > { %v465_v11 = vmax.f32 %v441_v7, 0.0 }
  0xe8   : > { %v442_v8 = vpop.f32.mrf.mxu0 }
  0xe9   : > { %v443_v9 = vadd.f32 %v1245_v35, %v442_v8 }
  0xeb   : > { %v466_v12 = vmax.f32 %v443_v9, 0.0 }
  0xed   : > { %v476_v13 = vpack.c.bf16 %v466_v12, %v465_v11 }
  0xef   : > { %580 = vmatmul.bf16.gmra.mxu1 %v476_v13 }
  0xf0   : > { %v445_v15 = vpop.f32.mrf.mxu0 }
  0xf1   : > { %v446_v18 = vadd.f32 %v1245_v35, %v445_v15 }
  0xf3   : > { %v467_v22 = vmax.f32 %v446_v18, 0.0 }
  0xf8   : > { %v447_v19 = vpop.f32.mrf.mxu0 }
  0xf9   : > { %v448_v20 = vadd.f32 %v1245_v35, %v447_v19 }
  0xfb   : > { %v468_v23 = vmax.f32 %v448_v20, 0.0 }
  0xfd   : > { %v477_v24 = vpack.c.bf16 %v468_v23, %v467_v22 }
  0xff   : > { %585 = vmatmul.bf16.gmra.mxu1 %v477_v24 }
 0x100   : > { %v450_v26 = vpop.f32.mrf.mxu0 }
 0x101   : > { %v451_v29 = vadd.f32 %v1245_v35, %v450_v26  ;;  %v1095_v26 = vld [vmem:[%s1387_s7 + $0x18] sm:$0xff] }
 0x102   : > { %833 = vmatpush.bf16.msra.mxu3 %v1095_v26 }
 0x103   : > { %v469_v32 = vmax.f32 %v451_v29, 0.0 }
 0x106   : > { %834 = vmatpush.bf16.msra.mxu3 %v1094_v27 }
 0x108   : > { %v452_v30 = vpop.f32.mrf.mxu0 }
 0x109   : > { %v453_v31 = vadd.f32 %v1245_v35, %v452_v30  ;;  %v1093_v30 = vld [vmem:[%s1387_s7 + $0x8] sm:$0xff] }
 0x10a   : > { %835 = vmatpush.bf16.msra.mxu3 %v1093_v30 }
 0x10b   : > { %v470_v33 = vmax.f32 %v453_v31, 0.0 }
 0x10d   : > { %v478_v34 = vpack.c.bf16 %v470_v33, %v469_v32 }
 0x10f   : > { %590 = vmatmul.bf16.gmra.mxu1 %v478_v34  ;;  %v1092_v34 = vld [vmem:[%s1387_s7] sm:$0xff] }
 0x110   : > { %836 = vmatpush.bf16.msra.mxu3 %v1092_v34 }
 0x11c   : > { %v556_v36 = vpop.f32.mrf.mxu1 }
 0x11d   : > { %v557_v38 = vadd.f32 %v1290_v37, %v556_v36 }
 0x11f   : > { %v596_v41 = vmax.f32 %v557_v38, 0.0 }
 0x124   : > { %v558_v39 = vpop.f32.mrf.mxu1 }
 0x125   : > { %v559_v40 = vadd.f32 %v1290_v37, %v558_v39  ;;  %v1110_v39 = vld [vmem:[%s1386_s6] ss:$0 sm:$0xff] }
 0x127   : > { %v597_v42 = vmax.f32 %v559_v40, 0.0 }
 0x129   : > { %v612_v43 = vpack.c.bf16 %v597_v42, %v596_v41 }
 0x12b   : > { %696 = vmatmul.bf16.vlgmr.msra.gmra.mxu2 %v612_v43 }
 0x12c   : > { %v561_v35 = vpop.f32.mrf.mxu1 }
 0x12d   : > { %v562_v44 = vadd.f32 %v1290_v37, %v561_v35 }
 0x12f   : > { %v598_v47 = vmax.f32 %v562_v44, 0.0 }
 0x134   : > { %v563_v45 = vpop.f32.mrf.mxu1 }
 0x135   : > { %v564_v46 = vadd.f32 %v1290_v37, %v563_v45 }
 0x137   : > { %v599_v48 = vmax.f32 %v564_v46, 0.0 }
 0x139   : > { %v613_v49 = vpack.c.bf16 %v599_v48, %v598_v47 }
 0x13b   : > { %701 = vmatmul.bf16.gmra.mxu2 %v613_v49 }
 0x13c   : > { %v566_v50 = vpop.f32.mrf.mxu1 }
 0x13d   : > { %v567_v51 = vadd.f32 %v1290_v37, %v566_v50 }
 0x13f   : > { %v600_v54 = vmax.f32 %v567_v51, 0.0 }
 0x144   : > { %v568_v52 = vpop.f32.mrf.mxu1 }
 0x145   : > { %v569_v53 = vadd.f32 %v1290_v37, %v568_v52 }
 0x147   : > { %v601_v55 = vmax.f32 %v569_v53, 0.0 }
 0x149   : > { %v614_v56 = vpack.c.bf16 %v601_v55, %v600_v54 }
 0x14b   : > { %706 = vmatmul.bf16.gmra.mxu2 %v614_v56 }
 0x14c   : > { %v571_v57 = vpop.f32.mrf.mxu1 }
 0x14d   : > { %v572_v58 = vadd.f32 %v1290_v37, %v571_v57 }
 0x14f   : > { %v602_v61 = vmax.f32 %v572_v58, 0.0 }
 0x154   : > { %v573_v59 = vpop.f32.mrf.mxu1 }
 0x155   : > { %v574_v60 = vadd.f32 %v1290_v37, %v573_v59 }
 0x157   : > { %v603_v62 = vmax.f32 %v574_v60, 0.0 }
 0x159   : > { %v615_v63 = vpack.c.bf16 %v603_v62, %v602_v61 }
 0x15b   : > { %711 = vmatmul.bf16.gmra.mxu2 %v615_v63 }
 0x15c   : > { %v576_v0 = vpop.f32.mrf.mxu1 }
 0x15d   : > { %v577_v1 = vadd.f32 %v1290_v37, %v576_v0 }
 0x15f   : > { %v604_v4 = vmax.f32 %v577_v1, 0.0 }
 0x164   : > { %v578_v2 = vpop.f32.mrf.mxu1 }
 0x165   : > { %v579_v3 = vadd.f32 %v1290_v37, %v578_v2 }
 0x167   : > { %v605_v5 = vmax.f32 %v579_v3, 0.0 }
 0x169   : > { %v616_v6 = vpack.c.bf16 %v605_v5, %v604_v4 }
 0x16b   : > { %716 = vmatmul.bf16.gmra.mxu2 %v616_v6 }
 0x16c   : > { %v581_v7 = vpop.f32.mrf.mxu1 }
 0x16d   : > { %v582_v8 = vadd.f32 %v1290_v37, %v581_v7 }
 0x16f   : > { %v606_v11 = vmax.f32 %v582_v8, 0.0 }
 0x174   : > { %v583_v9 = vpop.f32.mrf.mxu1 }
 0x175   : > { %v584_v10 = vadd.f32 %v1290_v37, %v583_v9 }
 0x177   : > { %v607_v12 = vmax.f32 %v584_v10, 0.0 }
 0x179   : > { %v617_v13 = vpack.c.bf16 %v607_v12, %v606_v11 }
 0x17b   : > { %721 = vmatmul.bf16.gmra.mxu2 %v617_v13 }
 0x17c   : > { %v586_v15 = vpop.f32.mrf.mxu1 }
 0x17d   : > { %v587_v18 = vadd.f32 %v1290_v37, %v586_v15 }
 0x17f   : > { %v608_v22 = vmax.f32 %v587_v18, 0.0 }
 0x184   : > { %v588_v19 = vpop.f32.mrf.mxu1 }
 0x185   : > { %v589_v20 = vadd.f32 %v1290_v37, %v588_v19 }
 0x187   : > { %v609_v23 = vmax.f32 %v589_v20, 0.0 }
 0x189   : > { %v618_v24 = vpack.c.bf16 %v609_v23, %v608_v22 }
 0x18b   : > { %726 = vmatmul.bf16.gmra.mxu2 %v618_v24 }
 0x18c   : > { %v591_v25 = vpop.f32.mrf.mxu1 }
 0x18d   : > { %v592_v28 = vadd.f32 %v1290_v37, %v591_v25 }
 0x18f   : > { %v610_v32 = vmax.f32 %v592_v28, 0.0 }
 0x194   : > { %v593_v29 = vpop.f32.mrf.mxu1 }
 0x195   : > { %v594_v31 = vadd.f32 %v1290_v37, %v593_v29  ;;  %v1111_v29 = vld [vmem:[%s1388_s8] ss:$0 sm:$0xff] }
 0x197   : > { %v611_v33 = vmax.f32 %v594_v31, 0.0 }
 0x199   : > { %v619_v36 = vpack.c.bf16 %v611_v33, %v610_v32 }
 0x19b   : > { %731 = vmatmul.bf16.gmra.mxu2 %v619_v36 }
 0x1ae   : > { %v697_v38 = vpop.f32.mrf.mxu2 }
 0x1af   : > { %v698_v40 = vadd.f32 %v1110_v39, %v697_v38 }
 0x1b1   : > { %v737_v43 = vmax.f32 %v698_v40, 0.0 }
 0x1b6   : > { %v699_v41 = vpop.f32.mrf.mxu2 }
 0x1b7   : > { %v700_v42 = vadd.f32 %v1110_v39, %v699_v41 }
 0x1b9   : > { %v738_v37 = vmax.f32 %v700_v42, 0.0 }
 0x1bb   : > { %v753_v35 = vpack.c.bf16 %v738_v37, %v737_v43 }
 0x1bd   : > { %837 = vmatmul.bf16.vlgmr.msra.gmra.mxu3 %v753_v35 }
 0x1be   : > { %v702_v44 = vpop.f32.mrf.mxu2 }
 0x1bf   : > { %v703_v45 = vadd.f32 %v1110_v39, %v702_v44 }
 0x1c1   : > { %v739_v48 = vmax.f32 %v703_v45, 0.0 }
 0x1c6   : > { %v704_v46 = vpop.f32.mrf.mxu2 }
 0x1c7   : > { %v705_v47 = vadd.f32 %v1110_v39, %v704_v46 }
 0x1c9   : > { %v740_v49 = vmax.f32 %v705_v47, 0.0 }
 0x1cb   : > { %v754_v50 = vpack.c.bf16 %v740_v49, %v739_v48 }
 0x1cd   : > { %842 = vmatmul.bf16.gmra.mxu3 %v754_v50 }
 0x1ce   : > { %v707_v51 = vpop.f32.mrf.mxu2 }
 0x1cf   : > { %v708_v52 = vadd.f32 %v1110_v39, %v707_v51 }
 0x1d1   : > { %v741_v55 = vmax.f32 %v708_v52, 0.0 }
 0x1d6   : > { %v709_v53 = vpop.f32.mrf.mxu2 }
 0x1d7   : > { %v710_v54 = vadd.f32 %v1110_v39, %v709_v53 }
 0x1d9   : > { %v742_v56 = vmax.f32 %v710_v54, 0.0 }
 0x1db   : > { %v755_v57 = vpack.c.bf16 %v742_v56, %v741_v55 }
 0x1dd   : > { %847 = vmatmul.bf16.gmra.mxu3 %v755_v57 }
 0x1de   : > { %v712_v58 = vpop.f32.mrf.mxu2 }
 0x1df   : > { %v713_v59 = vadd.f32 %v1110_v39, %v712_v58 }
 0x1e1   : > { %v743_v62 = vmax.f32 %v713_v59, 0.0 }
 0x1e6   : > { %v714_v60 = vpop.f32.mrf.mxu2 }
 0x1e7   : > { %v715_v61 = vadd.f32 %v1110_v39, %v714_v60 }
 0x1e9   : > { %v744_v63 = vmax.f32 %v715_v61, 0.0 }
 0x1eb   : > { %v756_v0 = vpack.c.bf16 %v744_v63, %v743_v62 }
 0x1ed   : > { %852 = vmatmul.bf16.gmra.mxu3 %v756_v0 }
 0x1ee   : > { %v717_v1 = vpop.f32.mrf.mxu2 }
 0x1ef   : > { %v718_v2 = vadd.f32 %v1110_v39, %v717_v1 }
 0x1f1   : > { %v745_v5 = vmax.f32 %v718_v2, 0.0 }
 0x1f6   : > { %v719_v3 = vpop.f32.mrf.mxu2 }
 0x1f7   : > { %v720_v4 = vadd.f32 %v1110_v39, %v719_v3 }
 0x1f9   : > { %v746_v6 = vmax.f32 %v720_v4, 0.0 }
 0x1fb   : > { %v757_v7 = vpack.c.bf16 %v746_v6, %v745_v5 }
 0x1fd   : > { %857 = vmatmul.bf16.gmra.mxu3 %v757_v7 }
 0x1fe   : > { %v722_v8 = vpop.f32.mrf.mxu2 }
 0x1ff   : > { %v723_v9 = vadd.f32 %v1110_v39, %v722_v8 }
 0x201   : > { %v747_v12 = vmax.f32 %v723_v9, 0.0 }
 0x206   : > { %v724_v10 = vpop.f32.mrf.mxu2 }
 0x207   : > { %v725_v11 = vadd.f32 %v1110_v39, %v724_v10 }
 0x209   : > { %v748_v13 = vmax.f32 %v725_v11, 0.0 }
 0x20b   : > { %v758_v14 = vpack.c.bf16 %v748_v13, %v747_v12 }
 0x20d   : > { %862 = vmatmul.bf16.gmra.mxu3 %v758_v14 }
 0x20e   : > { %v727_v15 = vpop.f32.mrf.mxu2 }
 0x20f   : > { %v728_v16 = vadd.f32 %v1110_v39, %v727_v15 }
 0x211   : > { %v749_v19 = vmax.f32 %v728_v16, 0.0 }
 0x216   : > { %v729_v17 = vpop.f32.mrf.mxu2 }
 0x217   : > { %v730_v18 = vadd.f32 %v1110_v39, %v729_v17 }
 0x219   : > { %v750_v20 = vmax.f32 %v730_v18, 0.0 }
 0x21b   : > { %v759_v21 = vpack.c.bf16 %v750_v20, %v749_v19 }
 0x21d   : > { %867 = vmatmul.bf16.gmra.mxu3 %v759_v21 }
 0x21e   : > { %v732_v22 = vpop.f32.mrf.mxu2 }
 0x21f   : > { %v733_v23 = vadd.f32 %v1110_v39, %v732_v22 }
 0x221   : > { %v751_v26 = vmax.f32 %v733_v23, 0.0 }
 0x226   : > { %v734_v24 = vpop.f32.mrf.mxu2 }
 0x227   : > { %v735_v25 = vadd.f32 %v1110_v39, %v734_v24 }
 0x229   : > { %v752_v27 = vmax.f32 %v735_v25, 0.0 }
 0x22b   : > { %v760_v28 = vpack.c.bf16 %v752_v27, %v751_v26 }
 0x22d   : > { %872 = vmatmul.bf16.gmra.mxu3 %v760_v28 }
 0x240   : > { %v838_v30 = vpop.f32.mrf.mxu3 }
 0x241   : > { %v839_v31 = vadd.f32 %v1111_v29, %v838_v30 }
 0x243   : > { %879 = vst.msk [vmem:[%s1343_s24] sm:$0xff] %vm878_vm1, %v839_v31 }
 0x248   : > { %v840_v32 = vpop.f32.mrf.mxu3 }
 0x249   : > { %v841_v33 = vadd.f32 %v1111_v29, %v840_v32 }
 0x24b   : > { %880 = vst.msk [vmem:[%s1343_s24 + $0x8] sm:$0xff] %vm878_vm1, %v841_v33 }
 0x250   : > { %v843_v34 = vpop.f32.mrf.mxu3 }
 0x251   : > { %v844_v36 = vadd.f32 %v1111_v29, %v843_v34 }
 0x253   : > { %881 = vst.msk [vmem:[%s1343_s24 + $0x10] sm:$0xff] %vm878_vm1, %v844_v36 }
 0x258   : > { %v845_v38 = vpop.f32.mrf.mxu3 }
 0x259   : > { %v846_v39 = vadd.f32 %v1111_v29, %v845_v38 }
 0x25b   : > { %882 = vst.msk [vmem:[%s1343_s24 + $0x18] sm:$0xff] %vm878_vm1, %v846_v39 }
 0x260   : > { %v848_v40 = vpop.f32.mrf.mxu3 }
 0x261   : > { %v849_v41 = vadd.f32 %v1111_v29, %v848_v40 }
 0x263   : > { %883 = vst.msk [vmem:[%s1343_s24 + $0x20] sm:$0xff] %vm878_vm1, %v849_v41 }
 0x268   : > { %v850_v42 = vpop.f32.mrf.mxu3 }
 0x269   : > { %v851_v43 = vadd.f32 %v1111_v29, %v850_v42 }
 0x26b   : > { %884 = vst.msk [vmem:[%s1343_s24 + $0x28] sm:$0xff] %vm878_vm1, %v851_v43 }
 0x270   : > { %v853_v37 = vpop.f32.mrf.mxu3 }
 0x271   : > { %v854_v35 = vadd.f32 %v1111_v29, %v853_v37 }
 0x273   : > { %885 = vst.msk [vmem:[%s1343_s24 + $0x30] sm:$0xff] %vm878_vm1, %v854_v35 }
 0x278   : > { %v855_v44 = vpop.f32.mrf.mxu3 }
 0x279   : > { %v856_v45 = vadd.f32 %v1111_v29, %v855_v44 }
 0x27b   : > { %886 = vst.msk [vmem:[%s1343_s24 + $0x38] sm:$0xff] %vm878_vm1, %v856_v45 }
 0x280   : > { %v858_v46 = vpop.f32.mrf.mxu3 }
 0x281   : > { %v859_v47 = vadd.f32 %v1111_v29, %v858_v46 }
 0x283   : > { %887 = vst.msk [vmem:[%s1343_s24 + $0x40] sm:$0xff] %vm878_vm1, %v859_v47 }
 0x288   : > { %v860_v48 = vpop.f32.mrf.mxu3 }
 0x289   : > { %v861_v49 = vadd.f32 %v1111_v29, %v860_v48 }
 0x28b   : > { %888 = vst.msk [vmem:[%s1343_s24 + $0x48] sm:$0xff] %vm878_vm1, %v861_v49 }
 0x290   : > { %v863_v50 = vpop.f32.mrf.mxu3 }
 0x291   : > { %v864_v51 = vadd.f32 %v1111_v29, %v863_v50 }
 0x293   : > { %889 = vst.msk [vmem:[%s1343_s24 + $0x50] sm:$0xff] %vm878_vm1, %v864_v51 }
 0x298   : > { %v865_v52 = vpop.f32.mrf.mxu3 }
 0x299   : > { %v866_v53 = vadd.f32 %v1111_v29, %v865_v52 }
 0x29b   : > { %890 = vst.msk [vmem:[%s1343_s24 + $0x58] sm:$0xff] %vm878_vm1, %v866_v53 }
 0x2a0   : > { %v868_v54 = vpop.f32.mrf.mxu3 }
 0x2a1   : > { %v869_v55 = vadd.f32 %v1111_v29, %v868_v54 }
 0x2a3   : > { %891 = vst.msk [vmem:[%s1343_s24 + $0x60] sm:$0xff] %vm878_vm1, %v869_v55 }
 0x2a8   : > { %v870_v56 = vpop.f32.mrf.mxu3 }
 0x2a9   : > { %v871_v57 = vadd.f32 %v1111_v29, %v870_v56 }
 0x2ab   : > { %892 = vst.msk [vmem:[%s1343_s24 + $0x68] sm:$0xff] %vm878_vm1, %v871_v57 }
 0x2b0   : > { %v873_v58 = vpop.f32.mrf.mxu3 }
 0x2b1   : > { %v874_v59 = vadd.f32 %v1111_v29, %v873_v58 }
 0x2b3   : > { %893 = vst.msk [vmem:[%s1343_s24 + $0x70] sm:$0xff] %vm878_vm1, %v874_v59 }
 0x2b8   : > { %v875_v60 = vpop.f32.mrf.mxu3 }
 0x2b9   : > { %v876_v61 = vadd.f32 %v1111_v29, %v875_v60 }
 0x2bb   : > { %894 = vst.msk [vmem:[%s1343_s24 + $0x78] sm:$0xff] %vm878_vm1, %v876_v61 }
 0x2bc PF: > { %s19_s30 = sadd.s32 1, %s1118_s30  }
 0x2bd   : > { %p16_p4 = scmp.ge.s32.totalorder %s19_s30, 4  }
 0x2bf   :  { %18 = sbr.rel (!%p16_p4) target bundleno = 1 (0x1), region = 86 }

</bundles_post_ra>
